<compile_context>
chip_gen: v6e
topology: v6e:2x2x1
jax: 0.10.0
libtpu: 0.0.40
codegen_flags: <defaults>
</compile_context>

<pallas_src>
import jax
import jax.numpy as jnp
import numpy as np
from jax.experimental import pallas as pl
from jax.experimental.pallas import tpu as pltpu

EPS = 1e-5  # BatchNorm1d default eps


def khop_kernel(x_ref, xsub_ref, adj_ref, scat_ref,
                wgcn_ref, wo_ref, vec_ref, out_ref):
    """One grid step processes B_blk independent subgraph problems."""
    Bb, N, Dp = x_ref.shape
    Ns = xsub_ref.shape[1]

    # --- inner StructureExtractor (gcn, num_layers=3, concat=False, khopgnn=True) ---
    # Shared-weight matmul batched over the B_blk graphs; adjacency propagation per graph.
    h = xsub_ref[...].reshape(Bb * Ns, Dp)                       # bf16 [Bb*Ns, Dp]
    for l in range(3):
        hw = jnp.dot(h, wgcn_ref[l],
                     preferred_element_type=jnp.float32)          # [Bb*Ns, Dp] f32
        hw = hw.astype(jnp.bfloat16)
        ah = jnp.concatenate(
            [jnp.dot(adj_ref[b], hw[b * Ns:(b + 1) * Ns, :],
                     preferred_element_type=jnp.float32)
             for b in range(Bb)], axis=0)                         # [Bb*Ns, Dp] f32
        bias = vec_ref[l:l + 1, :]                                # [1, Dp] f32
        h = jnp.maximum(ah + bias, 0.0).astype(jnp.bfloat16)

    # scatter_add(h, subgraph_indicator_index, dim=0) as per-graph one-hot matmul -> [Bb*N, Dp]
    s = jnp.concatenate(
        [jnp.dot(scat_ref[b], h[b * Ns:(b + 1) * Ns, :],
                 preferred_element_type=jnp.float32)
         for b in range(Bb)], axis=0)

    x = x_ref[...].reshape(Bb * N, Dp)                            # f32

    # --- outer KHopStructureExtractor: cat([x, x_struct], -1) -> BatchNorm1d -> Linear ---
    # BatchNorm (training mode, batch statistics) is computed per graph, matching one
    # PyTorch forward call per graph.  Padded feature columns stay exactly zero.
    def batchnorm(v_flat, gamma, beta):
        v = v_flat.reshape(Bb, N, Dp)
        mean = jnp.mean(v, axis=1, keepdims=True)
        var = jnp.mean((v - mean) ** 2, axis=1, keepdims=True)
        out = (v - mean) * jax.lax.rsqrt(var + EPS) * gamma + beta
        return out.reshape(Bb * N, Dp)

    bn_x = batchnorm(x, vec_ref[3:4, :], vec_ref[4:5, :])
    bn_s = batchnorm(s, vec_ref[5:6, :], vec_ref[6:7, :])

    # Fused output projection: one [Bb*N, 2*Dp] @ [2*Dp, Dp] matmul (K = 256).
    cat = jnp.concatenate([bn_x, bn_s], axis=-1).astype(jnp.bfloat16)
    out = (jnp.dot(cat, wo_ref[...], preferred_element_type=jnp.float32)
           + vec_ref[7:8, :])
    out_ref[...] = out.reshape(Bb, N, Dp)


def khop_structure_extractor(x, x_sub, adj_norm, scatter_mat, params):
    """Batched forward over B independent subgraph problems.

    x           : [B, N, D]   f32   node features
    x_sub       : [B, Ns, D]  f32   gathered subgraph-node features (x[subgraph_node_index])
    adj_norm    : [B, Ns, Ns] f32   dense GCN-normalized adjacency D^-1/2 (A+I) D^-1/2
    scatter_mat : [B, N, Ns]  f32   one-hot matrix implementing scatter_add over indicator index
    params      : (w1, b1, w2, b2, w3, b3, gamma_x, beta_x, gamma_s, beta_s, wo_x, wo_s, bo)
    returns     : [B, N, D]   f32
    """
    B, N, D = x.shape
    Ns = x_sub.shape[1]
    Dp = 128 * pl.cdiv(D, 128)                 # lane-dense feature width

    # Graphs per grid step: prefer >= 2 grid steps (v7x has 2 TCs), cap block at 4 graphs.
    B_blk = 1
    for cand in (4, 2):
        if B % cand == 0 and B // cand >= 2:
            B_blk = cand
            break

    w1, b1, w2, b2, w3, b3, gx, bx, gs, bs, wox, wos, bo = params

    def padf(a, shape, dtype):
        pads = [(0, t - s) for s, t in zip(a.shape, shape)]
        return jnp.pad(a, pads).astype(dtype)

    # Zero-padding the feature dim is exact: padded columns stay identically 0 through
    # the GCN layers, BatchNorm and the (zero-padded) output projection.
    xp = padf(x, (B, N, Dp), jnp.float32)
    xsp = padf(x_sub, (B, Ns, Dp), jnp.bfloat16)
    adjp = adj_norm.astype(jnp.bfloat16)
    scp = scatter_mat.astype(jnp.bfloat16)

    # Parameter consolidation: 3 inputs instead of 13 (fewer DMA descriptors / buffer slots).
    wgcn = jnp.stack([padf(w, (Dp, Dp), jnp.bfloat16) for w in (w1, w2, w3)], axis=0)  # [3,Dp,Dp]
    wo = jnp.concatenate([padf(wox, (Dp, Dp), jnp.bfloat16),
                          padf(wos, (Dp, Dp), jnp.bfloat16)], axis=0)                  # [2Dp,Dp]
    vec = jnp.concatenate([padf(v, (1, Dp), jnp.float32)
                           for v in (b1, b2, b3, gx, bx, gs, bs, bo)], axis=0)         # [8,Dp]

    grid = (B // B_blk,)
    in_specs = [
        pl.BlockSpec((B_blk, N, Dp), lambda g: (g, 0, 0)),      # x
        pl.BlockSpec((B_blk, Ns, Dp), lambda g: (g, 0, 0)),     # x_sub
        pl.BlockSpec((B_blk, Ns, Ns), lambda g: (g, 0, 0)),     # adj_norm
        pl.BlockSpec((B_blk, N, Ns), lambda g: (g, 0, 0)),      # scatter_mat
        # constant index_maps -> parameters stay VMEM-resident across the batch grid axis
        pl.BlockSpec((3, Dp, Dp), lambda g: (0, 0, 0)),         # GCN weight stack
        pl.BlockSpec((2 * Dp, Dp), lambda g: (0, 0)),           # fused out-proj weight
        pl.BlockSpec((8, Dp), lambda g: (0, 0)),                # bias / BN parameter stack
    ]

    out_padded = pl.pallas_call(
        khop_kernel,
        out_shape=jax.ShapeDtypeStruct((B, N, Dp), jnp.float32),
        grid=grid,
        in_specs=in_specs,
        out_specs=pl.BlockSpec((B_blk, N, Dp), lambda g: (g, 0, 0)),
        compiler_params=pltpu.CompilerParams(
            dimension_semantics=("parallel",)),                 # shards grid steps across TCs on v7x
    )(xp, xsp, adjp, scp, wgcn, wo, vec)

    return out_padded[:, :, :D]


def make_params(key, embed_dim):
    D = embed_dim
    ks = jax.random.split(key, 8)
    scale = 0.1
    w1 = scale * jax.random.normal(ks[0], (D, D), jnp.float32)
    w2 = scale * jax.random.normal(ks[1], (D, D), jnp.float32)
    w3 = scale * jax.random.normal(ks[2], (D, D), jnp.float32)
    b1 = scale * jax.random.normal(ks[3], (1, D), jnp.float32)
    b2 = scale * jax.random.normal(ks[4], (1, D), jnp.float32)
    b3 = scale * jax.random.normal(ks[5], (1, D), jnp.float32)
    # BatchNorm1d(2*D) default init: gamma=1, beta=0 (split into the two D-wide halves)
    gamma_x = jnp.ones((1, D), jnp.float32)
    beta_x = jnp.zeros((1, D), jnp.float32)
    gamma_s = jnp.ones((1, D), jnp.float32)
    beta_s = jnp.zeros((1, D), jnp.float32)
    # out_proj: Linear(2*D, D), weight split into its x-half and struct-half
    wo = scale * jax.random.normal(ks[6], (2 * D, D), jnp.float32)
    wo_x, wo_s = wo[:D], wo[D:]
    bo = scale * jax.random.normal(ks[7], (1, D), jnp.float32)
    return (w1, b1, w2, b2, w3, b3, gamma_x, beta_x, gamma_s, beta_s, wo_x, wo_s, bo)


def reference_forward(x, x_sub, adj, scat, params):
    """Pure-JAX f32 reference of one KHopStructureExtractor forward (one graph)."""
    w1, b1, w2, b2, w3, b3, gx, bx, gs, bs, wox, wos, bo = params
    h = x_sub
    for w, bb in ((w1, b1), (w2, b2), (w3, b3)):
        h = jax.nn.relu(adj @ (h @ w) + bb)
    s = scat @ h

    def bn(v, g, be):
        m = v.mean(0, keepdims=True)
        var = ((v - m) ** 2).mean(0, keepdims=True)
        return (v - m) * jax.lax.rsqrt(var + EPS) * g + be

    return bn(x, gx, bx) @ wox + bn(s, gs, bs) @ wos + bo


if __name__ == "__main__":
    key = jax.random.PRNGKey(0)
    k_x, k_nidx, k_e, k_ind, k_params = jax.random.split(key, 5)

    B = 8            # number of independent subgraph problems
    embed_dim = 32   # D
    N = 16           # number of graph nodes per problem
    Ns = 64          # number of (gathered) subgraph nodes per problem
    E = 128          # number of subgraph edges per problem

    # graph inputs (batched)
    x = jax.random.normal(k_x, (B, N, embed_dim), jnp.float32)
    subgraph_node_index = jax.random.randint(k_nidx, (B, Ns), 0, N)
    subgraph_edge_index = jax.random.randint(k_e, (B, 2, E), 0, Ns)
    subgraph_indicator_index = jax.random.randint(k_ind, (B, Ns), 0, N)

    # glue: gather subgraph node features  (x[subgraph_node_index])
    x_sub = jnp.take_along_axis(x, subgraph_node_index[..., None], axis=1)  # [B, Ns, D]

    # glue: dense GCN-normalized adjacency with self loops  D^-1/2 (A + I) D^-1/2
    def build_adj(edge_index):
        src, dst = edge_index[0], edge_index[1]
        A = (jnp.zeros((Ns, Ns), jnp.float32).at[dst, src].add(1.0)
             + jnp.eye(Ns, dtype=jnp.float32))
        dinv = jax.lax.rsqrt(A.sum(axis=1))
        return A * dinv[:, None] * dinv[None, :]

    adj_norm = jax.vmap(build_adj)(subgraph_edge_index)                     # [B, Ns, Ns]

    # glue: one-hot scatter matrix implementing scatter_add over subgraph_indicator_index
    scatter_mat = jax.vmap(
        lambda ind: jax.nn.one_hot(ind, N, dtype=jnp.float32).T)(subgraph_indicator_index)  # [B, N, Ns]

    params = make_params(k_params, embed_dim)

    fwd = jax.jit(khop_structure_extractor)
    out = fwd(x, x_sub, adj_norm, scatter_mat, params)
    jax.block_until_ready(out)
    assert out.shape == (B, N, embed_dim)

    # pure-JAX f32 reference (bf16 matmul operands in the kernel -> loose tolerance)
    ref = jax.vmap(lambda a, b, c, d: reference_forward(a, b, c, d, params))(
        x, x_sub, adj_norm, scatter_mat)
    np.testing.assert_allclose(np.asarray(out), np.asarray(ref), rtol=1e-1, atol=1e-1)

    print("KERNEL_OK")
</pallas_src>

<mosaic_0001>
module attributes {stable_mosaic.version = 11 : i64} {
  func.func @khop_kernel(%arg0: i32, %arg1: memref<4x16x128xf32, #tpu.memory_space<vmem>>, %arg2: memref<4x64x128xbf16, #tpu.memory_space<vmem>>, %arg3: memref<4x64x64xbf16, #tpu.memory_space<vmem>>, %arg4: memref<4x16x64xbf16, #tpu.memory_space<vmem>>, %arg5: memref<3x128x128xbf16, #tpu.memory_space<vmem>>, %arg6: memref<256x128xbf16, #tpu.memory_space<vmem>>, %arg7: memref<8x128xf32, #tpu.memory_space<vmem>>, %arg8: memref<4x16x128xf32, #tpu.memory_space<vmem>>) attributes {dimension_semantics = [#tpu.dimension_semantics<parallel>], iteration_bounds = array<i64: 2>, scalar_prefetch = 0 : i64, scratch_operands = 0 : i64, tpu.core_type = #tpu.core_type<tc>, window_params = [{transform_indices = @transform_0, window_bounds = array<i64: 4, 16, 128>}, {transform_indices = @transform_1, window_bounds = array<i64: 4, 64, 128>}, {transform_indices = @transform_2, window_bounds = array<i64: 4, 64, 64>}, {transform_indices = @transform_3, window_bounds = array<i64: 4, 16, 64>}, {pipeline_mode = #tpu.pipeline_mode<synchronous>, transform_indices = @transform_4, window_bounds = array<i64: 3, 128, 128>}, {pipeline_mode = #tpu.pipeline_mode<synchronous>, transform_indices = @transform_5, window_bounds = array<i64: 256, 128>}, {pipeline_mode = #tpu.pipeline_mode<synchronous>, transform_indices = @transform_6, window_bounds = array<i64: 8, 128>}, {transform_indices = @transform_7, window_bounds = array<i64: 4, 16, 128>}]} {
    %c0 = arith.constant 0 : index
    %c0_0 = arith.constant 0 : index
    %c0_1 = arith.constant 0 : index
    %0 = vector.load %arg2[%c0, %c0_0, %c0_1] : memref<4x64x128xbf16, #tpu.memory_space<vmem>>, vector<4x64x128xbf16>
    %1 = vector.shape_cast %0 : vector<4x64x128xbf16> to vector<256x128xbf16>
    %c0_2 = arith.constant 0 : index
    %c0_3 = arith.constant 0 : index
    %c0_4 = arith.constant 0 : index
    %2 = vector.load %arg5[%c0_2, %c0_3, %c0_4] : memref<3x128x128xbf16, #tpu.memory_space<vmem>>, vector<1x128x128xbf16>
    %3 = vector.shape_cast %2 : vector<1x128x128xbf16> to vector<128x128xbf16>
    %cst = arith.constant dense<0.000000e+00> : vector<256x128xf32>
    %4 = tpu.matmul %1, %3, %cst {dimension_numbers = #tpu.dot_dimension_numbers<[1], [0], [0], [1], [0, 0, 1, 1], [], []>} : vector<256x128xbf16>, vector<128x128xbf16>, vector<256x128xf32> -> vector<256x128xf32>
    %5 = arith.truncf %4 : vector<256x128xf32> to vector<256x128xbf16>
    %c0_5 = arith.constant 0 : index
    %c0_6 = arith.constant 0 : index
    %c0_7 = arith.constant 0 : index
    %6 = vector.load %arg3[%c0_5, %c0_6, %c0_7] : memref<4x64x64xbf16, #tpu.memory_space<vmem>>, vector<1x64x64xbf16>
    %7 = vector.shape_cast %6 : vector<1x64x64xbf16> to vector<64x64xbf16>
    %8 = vector.extract_strided_slice %5 {offsets = [0, 0], sizes = [64, 128], strides = [1, 1]} : vector<256x128xbf16> to vector<64x128xbf16>
    %cst_8 = arith.constant dense<0.000000e+00> : vector<64x128xf32>
    %9 = tpu.matmul %7, %8, %cst_8 {dimension_numbers = #tpu.dot_dimension_numbers<[1], [0], [0], [1], [0, 0, 1, 1], [], []>} : vector<64x64xbf16>, vector<64x128xbf16>, vector<64x128xf32> -> vector<64x128xf32>
    %c1 = arith.constant 1 : index
    %c0_9 = arith.constant 0 : index
    %c0_10 = arith.constant 0 : index
    %10 = vector.load %arg3[%c1, %c0_9, %c0_10] : memref<4x64x64xbf16, #tpu.memory_space<vmem>>, vector<1x64x64xbf16>
    %11 = vector.shape_cast %10 : vector<1x64x64xbf16> to vector<64x64xbf16>
    %12 = vector.extract_strided_slice %5 {offsets = [64, 0], sizes = [64, 128], strides = [1, 1]} : vector<256x128xbf16> to vector<64x128xbf16>
    %cst_11 = arith.constant dense<0.000000e+00> : vector<64x128xf32>
    %13 = tpu.matmul %11, %12, %cst_11 {dimension_numbers = #tpu.dot_dimension_numbers<[1], [0], [0], [1], [0, 0, 1, 1], [], []>} : vector<64x64xbf16>, vector<64x128xbf16>, vector<64x128xf32> -> vector<64x128xf32>
    %c2 = arith.constant 2 : index
    %c0_12 = arith.constant 0 : index
    %c0_13 = arith.constant 0 : index
    %14 = vector.load %arg3[%c2, %c0_12, %c0_13] : memref<4x64x64xbf16, #tpu.memory_space<vmem>>, vector<1x64x64xbf16>
    %15 = vector.shape_cast %14 : vector<1x64x64xbf16> to vector<64x64xbf16>
    %16 = vector.extract_strided_slice %5 {offsets = [128, 0], sizes = [64, 128], strides = [1, 1]} : vector<256x128xbf16> to vector<64x128xbf16>
    %cst_14 = arith.constant dense<0.000000e+00> : vector<64x128xf32>
    %17 = tpu.matmul %15, %16, %cst_14 {dimension_numbers = #tpu.dot_dimension_numbers<[1], [0], [0], [1], [0, 0, 1, 1], [], []>} : vector<64x64xbf16>, vector<64x128xbf16>, vector<64x128xf32> -> vector<64x128xf32>
    %c3 = arith.constant 3 : index
    %c0_15 = arith.constant 0 : index
    %c0_16 = arith.constant 0 : index
    %18 = vector.load %arg3[%c3, %c0_15, %c0_16] : memref<4x64x64xbf16, #tpu.memory_space<vmem>>, vector<1x64x64xbf16>
    %19 = vector.shape_cast %18 : vector<1x64x64xbf16> to vector<64x64xbf16>
    %20 = vector.extract_strided_slice %5 {offsets = [192, 0], sizes = [64, 128], strides = [1, 1]} : vector<256x128xbf16> to vector<64x128xbf16>
    %cst_17 = arith.constant dense<0.000000e+00> : vector<64x128xf32>
    %21 = tpu.matmul %19, %20, %cst_17 {dimension_numbers = #tpu.dot_dimension_numbers<[1], [0], [0], [1], [0, 0, 1, 1], [], []>} : vector<64x64xbf16>, vector<64x128xbf16>, vector<64x128xf32> -> vector<64x128xf32>
    %22 = tpu.concatenate %9, %13, %17, %21 in 0 : vector<64x128xf32>, vector<64x128xf32>, vector<64x128xf32>, vector<64x128xf32> -> vector<256x128xf32>
    %c0_18 = arith.constant 0 : index
    %c0_19 = arith.constant 0 : index
    %23 = vector.load %arg7[%c0_18, %c0_19] : memref<8x128xf32, #tpu.memory_space<vmem>>, vector<1x128xf32>
    %24 = vector.broadcast %23 : vector<1x128xf32> to vector<256x128xf32>
    %25 = arith.addf %22, %24 : vector<256x128xf32>
    %cst_20 = arith.constant 0.000000e+00 : f32
    %26 = vector.broadcast %cst_20 : f32 to vector<256x128xf32>
    %27 = arith.maximumf %25, %26 : vector<256x128xf32>
    %28 = arith.truncf %27 : vector<256x128xf32> to vector<256x128xbf16>
    %c1_21 = arith.constant 1 : index
    %c0_22 = arith.constant 0 : index
    %c0_23 = arith.constant 0 : index
    %29 = vector.load %arg5[%c1_21, %c0_22, %c0_23] : memref<3x128x128xbf16, #tpu.memory_space<vmem>>, vector<1x128x128xbf16>
    %30 = vector.shape_cast %29 : vector<1x128x128xbf16> to vector<128x128xbf16>
    %cst_24 = arith.constant dense<0.000000e+00> : vector<256x128xf32>
    %31 = tpu.matmul %28, %30, %cst_24 {dimension_numbers = #tpu.dot_dimension_numbers<[1], [0], [0], [1], [0, 0, 1, 1], [], []>} : vector<256x128xbf16>, vector<128x128xbf16>, vector<256x128xf32> -> vector<256x128xf32>
    %32 = arith.truncf %31 : vector<256x128xf32> to vector<256x128xbf16>
    %c0_25 = arith.constant 0 : index
    %c0_26 = arith.constant 0 : index
    %c0_27 = arith.constant 0 : index
    %33 = vector.load %arg3[%c0_25, %c0_26, %c0_27] : memref<4x64x64xbf16, #tpu.memory_space<vmem>>, vector<1x64x64xbf16>
    %34 = vector.shape_cast %33 : vector<1x64x64xbf16> to vector<64x64xbf16>
    %35 = vector.extract_strided_slice %32 {offsets = [0, 0], sizes = [64, 128], strides = [1, 1]} : vector<256x128xbf16> to vector<64x128xbf16>
    %cst_28 = arith.constant dense<0.000000e+00> : vector<64x128xf32>
    %36 = tpu.matmul %34, %35, %cst_28 {dimension_numbers = #tpu.dot_dimension_numbers<[1], [0], [0], [1], [0, 0, 1, 1], [], []>} : vector<64x64xbf16>, vector<64x128xbf16>, vector<64x128xf32> -> vector<64x128xf32>
    %c1_29 = arith.constant 1 : index
    %c0_30 = arith.constant 0 : index
    %c0_31 = arith.constant 0 : index
    %37 = vector.load %arg3[%c1_29, %c0_30, %c0_31] : memref<4x64x64xbf16, #tpu.memory_space<vmem>>, vector<1x64x64xbf16>
    %38 = vector.shape_cast %37 : vector<1x64x64xbf16> to vector<64x64xbf16>
    %39 = vector.extract_strided_slice %32 {offsets = [64, 0], sizes = [64, 128], strides = [1, 1]} : vector<256x128xbf16> to vector<64x128xbf16>
    %cst_32 = arith.constant dense<0.000000e+00> : vector<64x128xf32>
    %40 = tpu.matmul %38, %39, %cst_32 {dimension_numbers = #tpu.dot_dimension_numbers<[1], [0], [0], [1], [0, 0, 1, 1], [], []>} : vector<64x64xbf16>, vector<64x128xbf16>, vector<64x128xf32> -> vector<64x128xf32>
    %c2_33 = arith.constant 2 : index
    %c0_34 = arith.constant 0 : index
    %c0_35 = arith.constant 0 : index
    %41 = vector.load %arg3[%c2_33, %c0_34, %c0_35] : memref<4x64x64xbf16, #tpu.memory_space<vmem>>, vector<1x64x64xbf16>
    %42 = vector.shape_cast %41 : vector<1x64x64xbf16> to vector<64x64xbf16>
    %43 = vector.extract_strided_slice %32 {offsets = [128, 0], sizes = [64, 128], strides = [1, 1]} : vector<256x128xbf16> to vector<64x128xbf16>
    %cst_36 = arith.constant dense<0.000000e+00> : vector<64x128xf32>
    %44 = tpu.matmul %42, %43, %cst_36 {dimension_numbers = #tpu.dot_dimension_numbers<[1], [0], [0], [1], [0, 0, 1, 1], [], []>} : vector<64x64xbf16>, vector<64x128xbf16>, vector<64x128xf32> -> vector<64x128xf32>
    %c3_37 = arith.constant 3 : index
    %c0_38 = arith.constant 0 : index
    %c0_39 = arith.constant 0 : index
    %45 = vector.load %arg3[%c3_37, %c0_38, %c0_39] : memref<4x64x64xbf16, #tpu.memory_space<vmem>>, vector<1x64x64xbf16>
    %46 = vector.shape_cast %45 : vector<1x64x64xbf16> to vector<64x64xbf16>
    %47 = vector.extract_strided_slice %32 {offsets = [192, 0], sizes = [64, 128], strides = [1, 1]} : vector<256x128xbf16> to vector<64x128xbf16>
    %cst_40 = arith.constant dense<0.000000e+00> : vector<64x128xf32>
    %48 = tpu.matmul %46, %47, %cst_40 {dimension_numbers = #tpu.dot_dimension_numbers<[1], [0], [0], [1], [0, 0, 1, 1], [], []>} : vector<64x64xbf16>, vector<64x128xbf16>, vector<64x128xf32> -> vector<64x128xf32>
    %49 = tpu.concatenate %36, %40, %44, %48 in 0 : vector<64x128xf32>, vector<64x128xf32>, vector<64x128xf32>, vector<64x128xf32> -> vector<256x128xf32>
    %c1_41 = arith.constant 1 : index
    %c0_42 = arith.constant 0 : index
    %50 = vector.load %arg7[%c1_41, %c0_42] : memref<8x128xf32, #tpu.memory_space<vmem>>, vector<1x128xf32>
    %51 = vector.broadcast %50 : vector<1x128xf32> to vector<256x128xf32>
    %52 = arith.addf %49, %51 : vector<256x128xf32>
    %cst_43 = arith.constant 0.000000e+00 : f32
    %53 = vector.broadcast %cst_43 : f32 to vector<256x128xf32>
    %54 = arith.maximumf %52, %53 : vector<256x128xf32>
    %55 = arith.truncf %54 : vector<256x128xf32> to vector<256x128xbf16>
    %c2_44 = arith.constant 2 : index
    %c0_45 = arith.constant 0 : index
    %c0_46 = arith.constant 0 : index
    %56 = vector.load %arg5[%c2_44, %c0_45, %c0_46] : memref<3x128x128xbf16, #tpu.memory_space<vmem>>, vector<1x128x128xbf16>
    %57 = vector.shape_cast %56 : vector<1x128x128xbf16> to vector<128x128xbf16>
    %cst_47 = arith.constant dense<0.000000e+00> : vector<256x128xf32>
    %58 = tpu.matmul %55, %57, %cst_47 {dimension_numbers = #tpu.dot_dimension_numbers<[1], [0], [0], [1], [0, 0, 1, 1], [], []>} : vector<256x128xbf16>, vector<128x128xbf16>, vector<256x128xf32> -> vector<256x128xf32>
    %59 = arith.truncf %58 : vector<256x128xf32> to vector<256x128xbf16>
    %c0_48 = arith.constant 0 : index
    %c0_49 = arith.constant 0 : index
    %c0_50 = arith.constant 0 : index
    %60 = vector.load %arg3[%c0_48, %c0_49, %c0_50] : memref<4x64x64xbf16, #tpu.memory_space<vmem>>, vector<1x64x64xbf16>
    %61 = vector.shape_cast %60 : vector<1x64x64xbf16> to vector<64x64xbf16>
    %62 = vector.extract_strided_slice %59 {offsets = [0, 0], sizes = [64, 128], strides = [1, 1]} : vector<256x128xbf16> to vector<64x128xbf16>
    %cst_51 = arith.constant dense<0.000000e+00> : vector<64x128xf32>
    %63 = tpu.matmul %61, %62, %cst_51 {dimension_numbers = #tpu.dot_dimension_numbers<[1], [0], [0], [1], [0, 0, 1, 1], [], []>} : vector<64x64xbf16>, vector<64x128xbf16>, vector<64x128xf32> -> vector<64x128xf32>
    %c1_52 = arith.constant 1 : index
    %c0_53 = arith.constant 0 : index
    %c0_54 = arith.constant 0 : index
    %64 = vector.load %arg3[%c1_52, %c0_53, %c0_54] : memref<4x64x64xbf16, #tpu.memory_space<vmem>>, vector<1x64x64xbf16>
    %65 = vector.shape_cast %64 : vector<1x64x64xbf16> to vector<64x64xbf16>
    %66 = vector.extract_strided_slice %59 {offsets = [64, 0], sizes = [64, 128], strides = [1, 1]} : vector<256x128xbf16> to vector<64x128xbf16>
    %cst_55 = arith.constant dense<0.000000e+00> : vector<64x128xf32>
    %67 = tpu.matmul %65, %66, %cst_55 {dimension_numbers = #tpu.dot_dimension_numbers<[1], [0], [0], [1], [0, 0, 1, 1], [], []>} : vector<64x64xbf16>, vector<64x128xbf16>, vector<64x128xf32> -> vector<64x128xf32>
    %c2_56 = arith.constant 2 : index
    %c0_57 = arith.constant 0 : index
    %c0_58 = arith.constant 0 : index
    %68 = vector.load %arg3[%c2_56, %c0_57, %c0_58] : memref<4x64x64xbf16, #tpu.memory_space<vmem>>, vector<1x64x64xbf16>
    %69 = vector.shape_cast %68 : vector<1x64x64xbf16> to vector<64x64xbf16>
    %70 = vector.extract_strided_slice %59 {offsets = [128, 0], sizes = [64, 128], strides = [1, 1]} : vector<256x128xbf16> to vector<64x128xbf16>
    %cst_59 = arith.constant dense<0.000000e+00> : vector<64x128xf32>
    %71 = tpu.matmul %69, %70, %cst_59 {dimension_numbers = #tpu.dot_dimension_numbers<[1], [0], [0], [1], [0, 0, 1, 1], [], []>} : vector<64x64xbf16>, vector<64x128xbf16>, vector<64x128xf32> -> vector<64x128xf32>
    %c3_60 = arith.constant 3 : index
    %c0_61 = arith.constant 0 : index
    %c0_62 = arith.constant 0 : index
    %72 = vector.load %arg3[%c3_60, %c0_61, %c0_62] : memref<4x64x64xbf16, #tpu.memory_space<vmem>>, vector<1x64x64xbf16>
    %73 = vector.shape_cast %72 : vector<1x64x64xbf16> to vector<64x64xbf16>
    %74 = vector.extract_strided_slice %59 {offsets = [192, 0], sizes = [64, 128], strides = [1, 1]} : vector<256x128xbf16> to vector<64x128xbf16>
    %cst_63 = arith.constant dense<0.000000e+00> : vector<64x128xf32>
    %75 = tpu.matmul %73, %74, %cst_63 {dimension_numbers = #tpu.dot_dimension_numbers<[1], [0], [0], [1], [0, 0, 1, 1], [], []>} : vector<64x64xbf16>, vector<64x128xbf16>, vector<64x128xf32> -> vector<64x128xf32>
    %76 = tpu.concatenate %63, %67, %71, %75 in 0 : vector<64x128xf32>, vector<64x128xf32>, vector<64x128xf32>, vector<64x128xf32> -> vector<256x128xf32>
    %c2_64 = arith.constant 2 : index
    %c0_65 = arith.constant 0 : index
    %77 = vector.load %arg7[%c2_64, %c0_65] : memref<8x128xf32, #tpu.memory_space<vmem>>, vector<1x128xf32>
    %78 = vector.broadcast %77 : vector<1x128xf32> to vector<256x128xf32>
    %79 = arith.addf %76, %78 : vector<256x128xf32>
    %cst_66 = arith.constant 0.000000e+00 : f32
    %80 = vector.broadcast %cst_66 : f32 to vector<256x128xf32>
    %81 = arith.maximumf %79, %80 : vector<256x128xf32>
    %82 = arith.truncf %81 : vector<256x128xf32> to vector<256x128xbf16>
    %c0_67 = arith.constant 0 : index
    %c0_68 = arith.constant 0 : index
    %c0_69 = arith.constant 0 : index
    %83 = vector.load %arg4[%c0_67, %c0_68, %c0_69] : memref<4x16x64xbf16, #tpu.memory_space<vmem>>, vector<1x16x64xbf16>
    %84 = vector.shape_cast %83 : vector<1x16x64xbf16> to vector<16x64xbf16>
    %85 = vector.extract_strided_slice %82 {offsets = [0, 0], sizes = [64, 128], strides = [1, 1]} : vector<256x128xbf16> to vector<64x128xbf16>
    %cst_70 = arith.constant dense<0.000000e+00> : vector<16x128xf32>
    %86 = tpu.matmul %84, %85, %cst_70 {dimension_numbers = #tpu.dot_dimension_numbers<[1], [0], [0], [1], [0, 0, 1, 1], [], []>} : vector<16x64xbf16>, vector<64x128xbf16>, vector<16x128xf32> -> vector<16x128xf32>
    %c1_71 = arith.constant 1 : index
    %c0_72 = arith.constant 0 : index
    %c0_73 = arith.constant 0 : index
    %87 = vector.load %arg4[%c1_71, %c0_72, %c0_73] : memref<4x16x64xbf16, #tpu.memory_space<vmem>>, vector<1x16x64xbf16>
    %88 = vector.shape_cast %87 : vector<1x16x64xbf16> to vector<16x64xbf16>
    %89 = vector.extract_strided_slice %82 {offsets = [64, 0], sizes = [64, 128], strides = [1, 1]} : vector<256x128xbf16> to vector<64x128xbf16>
    %cst_74 = arith.constant dense<0.000000e+00> : vector<16x128xf32>
    %90 = tpu.matmul %88, %89, %cst_74 {dimension_numbers = #tpu.dot_dimension_numbers<[1], [0], [0], [1], [0, 0, 1, 1], [], []>} : vector<16x64xbf16>, vector<64x128xbf16>, vector<16x128xf32> -> vector<16x128xf32>
    %c2_75 = arith.constant 2 : index
    %c0_76 = arith.constant 0 : index
    %c0_77 = arith.constant 0 : index
    %91 = vector.load %arg4[%c2_75, %c0_76, %c0_77] : memref<4x16x64xbf16, #tpu.memory_space<vmem>>, vector<1x16x64xbf16>
    %92 = vector.shape_cast %91 : vector<1x16x64xbf16> to vector<16x64xbf16>
    %93 = vector.extract_strided_slice %82 {offsets = [128, 0], sizes = [64, 128], strides = [1, 1]} : vector<256x128xbf16> to vector<64x128xbf16>
    %cst_78 = arith.constant dense<0.000000e+00> : vector<16x128xf32>
    %94 = tpu.matmul %92, %93, %cst_78 {dimension_numbers = #tpu.dot_dimension_numbers<[1], [0], [0], [1], [0, 0, 1, 1], [], []>} : vector<16x64xbf16>, vector<64x128xbf16>, vector<16x128xf32> -> vector<16x128xf32>
    %c3_79 = arith.constant 3 : index
    %c0_80 = arith.constant 0 : index
    %c0_81 = arith.constant 0 : index
    %95 = vector.load %arg4[%c3_79, %c0_80, %c0_81] : memref<4x16x64xbf16, #tpu.memory_space<vmem>>, vector<1x16x64xbf16>
    %96 = vector.shape_cast %95 : vector<1x16x64xbf16> to vector<16x64xbf16>
    %97 = vector.extract_strided_slice %82 {offsets = [192, 0], sizes = [64, 128], strides = [1, 1]} : vector<256x128xbf16> to vector<64x128xbf16>
    %cst_82 = arith.constant dense<0.000000e+00> : vector<16x128xf32>
    %98 = tpu.matmul %96, %97, %cst_82 {dimension_numbers = #tpu.dot_dimension_numbers<[1], [0], [0], [1], [0, 0, 1, 1], [], []>} : vector<16x64xbf16>, vector<64x128xbf16>, vector<16x128xf32> -> vector<16x128xf32>
    %99 = tpu.concatenate %86, %90, %94, %98 in 0 : vector<16x128xf32>, vector<16x128xf32>, vector<16x128xf32>, vector<16x128xf32> -> vector<64x128xf32>
    %c0_83 = arith.constant 0 : index
    %c0_84 = arith.constant 0 : index
    %c0_85 = arith.constant 0 : index
    %100 = vector.load %arg1[%c0_83, %c0_84, %c0_85] : memref<4x16x128xf32, #tpu.memory_space<vmem>>, vector<4x16x128xf32>
    %101 = vector.shape_cast %100 : vector<4x16x128xf32> to vector<64x128xf32>
    %c3_86 = arith.constant 3 : index
    %c0_87 = arith.constant 0 : index
    %102 = vector.load %arg7[%c3_86, %c0_87] : memref<8x128xf32, #tpu.memory_space<vmem>>, vector<1x128xf32>
    %c4 = arith.constant 4 : index
    %c0_88 = arith.constant 0 : index
    %103 = vector.load %arg7[%c4, %c0_88] : memref<8x128xf32, #tpu.memory_space<vmem>>, vector<1x128xf32>
    %104 = vector.shape_cast %101 : vector<64x128xf32> to vector<4x16x128xf32>
    %cst_89 = arith.constant dense<0.000000e+00> : vector<4x128xf32>
    %105 = vector.multi_reduction <add>, %104, %cst_89 [1] : vector<4x16x128xf32> to vector<4x128xf32>
    %106 = vector.shape_cast %105 : vector<4x128xf32> to vector<4x1x128xf32>
    %cst_90 = arith.constant 1.600000e+01 : f32
    %107 = vector.broadcast %cst_90 : f32 to vector<4x1x128xf32>
    %108 = arith.divf %106, %107 : vector<4x1x128xf32>
    %109 = vector.broadcast %108 : vector<4x1x128xf32> to vector<4x16x128xf32>
    %110 = arith.subf %104, %109 : vector<4x16x128xf32>
    %111 = arith.mulf %110, %110 : vector<4x16x128xf32>
    %cst_91 = arith.constant dense<0.000000e+00> : vector<4x128xf32>
    %112 = vector.multi_reduction <add>, %111, %cst_91 [1] : vector<4x16x128xf32> to vector<4x128xf32>
    %113 = vector.shape_cast %112 : vector<4x128xf32> to vector<4x1x128xf32>
    %cst_92 = arith.constant 1.600000e+01 : f32
    %114 = vector.broadcast %cst_92 : f32 to vector<4x1x128xf32>
    %115 = arith.divf %113, %114 : vector<4x1x128xf32>
    %116 = vector.broadcast %108 : vector<4x1x128xf32> to vector<4x16x128xf32>
    %117 = arith.subf %104, %116 : vector<4x16x128xf32>
    %cst_93 = arith.constant 9.99999974E-6 : f32
    %118 = vector.broadcast %cst_93 : f32 to vector<4x1x128xf32>
    %119 = arith.addf %115, %118 : vector<4x1x128xf32>
    %120 = math.rsqrt %119 : vector<4x1x128xf32>
    %121 = vector.broadcast %120 : vector<4x1x128xf32> to vector<4x16x128xf32>
    %122 = arith.mulf %117, %121 : vector<4x16x128xf32>
    %123 = vector.shape_cast %102 : vector<1x128xf32> to vector<1x1x128xf32>
    %124 = vector.broadcast %123 : vector<1x1x128xf32> to vector<4x16x128xf32>
    %125 = arith.mulf %122, %124 : vector<4x16x128xf32>
    %126 = vector.shape_cast %103 : vector<1x128xf32> to vector<1x1x128xf32>
    %127 = vector.broadcast %126 : vector<1x1x128xf32> to vector<4x16x128xf32>
    %128 = arith.addf %125, %127 : vector<4x16x128xf32>
    %129 = vector.shape_cast %128 : vector<4x16x128xf32> to vector<64x128xf32>
    %c5 = arith.constant 5 : index
    %c0_94 = arith.constant 0 : index
    %130 = vector.load %arg7[%c5, %c0_94] : memref<8x128xf32, #tpu.memory_space<vmem>>, vector<1x128xf32>
    %c6 = arith.constant 6 : index
    %c0_95 = arith.constant 0 : index
    %131 = vector.load %arg7[%c6, %c0_95] : memref<8x128xf32, #tpu.memory_space<vmem>>, vector<1x128xf32>
    %132 = vector.shape_cast %99 : vector<64x128xf32> to vector<4x16x128xf32>
    %cst_96 = arith.constant dense<0.000000e+00> : vector<4x128xf32>
    %133 = vector.multi_reduction <add>, %132, %cst_96 [1] : vector<4x16x128xf32> to vector<4x128xf32>
    %134 = vector.shape_cast %133 : vector<4x128xf32> to vector<4x1x128xf32>
    %cst_97 = arith.constant 1.600000e+01 : f32
    %135 = vector.broadcast %cst_97 : f32 to vector<4x1x128xf32>
    %136 = arith.divf %134, %135 : vector<4x1x128xf32>
    %137 = vector.broadcast %136 : vector<4x1x128xf32> to vector<4x16x128xf32>
    %138 = arith.subf %132, %137 : vector<4x16x128xf32>
    %139 = arith.mulf %138, %138 : vector<4x16x128xf32>
    %cst_98 = arith.constant dense<0.000000e+00> : vector<4x128xf32>
    %140 = vector.multi_reduction <add>, %139, %cst_98 [1] : vector<4x16x128xf32> to vector<4x128xf32>
    %141 = vector.shape_cast %140 : vector<4x128xf32> to vector<4x1x128xf32>
    %cst_99 = arith.constant 1.600000e+01 : f32
    %142 = vector.broadcast %cst_99 : f32 to vector<4x1x128xf32>
    %143 = arith.divf %141, %142 : vector<4x1x128xf32>
    %144 = vector.broadcast %136 : vector<4x1x128xf32> to vector<4x16x128xf32>
    %145 = arith.subf %132, %144 : vector<4x16x128xf32>
    %cst_100 = arith.constant 9.99999974E-6 : f32
    %146 = vector.broadcast %cst_100 : f32 to vector<4x1x128xf32>
    %147 = arith.addf %143, %146 : vector<4x1x128xf32>
    %148 = math.rsqrt %147 : vector<4x1x128xf32>
    %149 = vector.broadcast %148 : vector<4x1x128xf32> to vector<4x16x128xf32>
    %150 = arith.mulf %145, %149 : vector<4x16x128xf32>
    %151 = vector.shape_cast %130 : vector<1x128xf32> to vector<1x1x128xf32>
    %152 = vector.broadcast %151 : vector<1x1x128xf32> to vector<4x16x128xf32>
    %153 = arith.mulf %150, %152 : vector<4x16x128xf32>
    %154 = vector.shape_cast %131 : vector<1x128xf32> to vector<1x1x128xf32>
    %155 = vector.broadcast %154 : vector<1x1x128xf32> to vector<4x16x128xf32>
    %156 = arith.addf %153, %155 : vector<4x16x128xf32>
    %157 = vector.shape_cast %156 : vector<4x16x128xf32> to vector<64x128xf32>
    %158 = tpu.concatenate %129, %157 in 1 : vector<64x128xf32>, vector<64x128xf32> -> vector<64x256xf32>
    %159 = arith.truncf %158 : vector<64x256xf32> to vector<64x256xbf16>
    %c0_101 = arith.constant 0 : index
    %c0_102 = arith.constant 0 : index
    %160 = vector.load %arg6[%c0_101, %c0_102] : memref<256x128xbf16, #tpu.memory_space<vmem>>, vector<256x128xbf16>
    %cst_103 = arith.constant dense<0.000000e+00> : vector<64x128xf32>
    %161 = tpu.matmul %159, %160, %cst_103 {dimension_numbers = #tpu.dot_dimension_numbers<[1], [0], [0], [1], [0, 0, 1, 1], [], []>} : vector<64x256xbf16>, vector<256x128xbf16>, vector<64x128xf32> -> vector<64x128xf32>
    %c7 = arith.constant 7 : index
    %c0_104 = arith.constant 0 : index
    %162 = vector.load %arg7[%c7, %c0_104] : memref<8x128xf32, #tpu.memory_space<vmem>>, vector<1x128xf32>
    %163 = vector.broadcast %162 : vector<1x128xf32> to vector<64x128xf32>
    %164 = arith.addf %161, %163 : vector<64x128xf32>
    %165 = vector.shape_cast %164 : vector<64x128xf32> to vector<4x16x128xf32>
    %c0_105 = arith.constant 0 : index
    %c0_106 = arith.constant 0 : index
    %c0_107 = arith.constant 0 : index
    %166 = vector.load %arg8[%c0_105, %c0_106, %c0_107] : memref<4x16x128xf32, #tpu.memory_space<vmem>>, vector<4x16x128xf32>
    tpu.vector_store %arg8[%c0_105, %c0_106, %c0_107], %165 {strides = array<i32>} : memref<4x16x128xf32, #tpu.memory_space<vmem>>, vector<4x16x128xf32>,
    return
  }
  func.func @transform_0(%arg0: i32) -> (i32, i32, i32) {
    %c0_i32 = arith.constant 0 : i32
    %c0_i32_0 = arith.constant 0 : i32
    %c0_i32_1 = arith.constant 0 : i32
    return %arg0, %c0_i32, %c0_i32_0 : i32, i32, i32
  }
  func.func @transform_1(%arg0: i32) -> (i32, i32, i32) {
    %c0_i32 = arith.constant 0 : i32
    %c0_i32_0 = arith.constant 0 : i32
    %c0_i32_1 = arith.constant 0 : i32
    return %arg0, %c0_i32, %c0_i32_0 : i32, i32, i32
  }
  func.func @transform_2(%arg0: i32) -> (i32, i32, i32) {
    %c0_i32 = arith.constant 0 : i32
    %c0_i32_0 = arith.constant 0 : i32
    %c0_i32_1 = arith.constant 0 : i32
    return %arg0, %c0_i32, %c0_i32_0 : i32, i32, i32
  }
  func.func @transform_3(%arg0: i32) -> (i32, i32, i32) {
    %c0_i32 = arith.constant 0 : i32
    %c0_i32_0 = arith.constant 0 : i32
    %c0_i32_1 = arith.constant 0 : i32
    return %arg0, %c0_i32, %c0_i32_0 : i32, i32, i32
  }
  func.func @transform_4(%arg0: i32) -> (i32, i32, i32) {
    %c0_i32 = arith.constant 0 : i32
    %c0_i32_0 = arith.constant 0 : i32
    %c0_i32_1 = arith.constant 0 : i32
    %c0_i32_2 = arith.constant 0 : i32
    return %c0_i32, %c0_i32_0, %c0_i32_1 : i32, i32, i32
  }
  func.func @transform_5(%arg0: i32) -> (i32, i32) {
    %c0_i32 = arith.constant 0 : i32
    %c0_i32_0 = arith.constant 0 : i32
    %c0_i32_1 = arith.constant 0 : i32
    return %c0_i32, %c0_i32_0 : i32, i32
  }
  func.func @transform_6(%arg0: i32) -> (i32, i32) {
    %c0_i32 = arith.constant 0 : i32
    %c0_i32_0 = arith.constant 0 : i32
    %c0_i32_1 = arith.constant 0 : i32
    return %c0_i32, %c0_i32_0 : i32, i32
  }
  func.func @transform_7(%arg0: i32) -> (i32, i32, i32) {
    %c0_i32 = arith.constant 0 : i32
    %c0_i32_0 = arith.constant 0 : i32
    %c0_i32_1 = arith.constant 0 : i32
    return %arg0, %c0_i32, %c0_i32_0 : i32, i32, i32
  }
}

</mosaic_0001>

<bundles_post_ra>
// kernel: khop_structure_extractor.1
= control target key start
LH: loop header
LB: loop body
LE: loop exit
PB: predicated region body
PF: predicated region fallthrough
CT: control target
= control target key end

     0   :  { %12 = vsyncpa [#allocation3], 0  ;;  %s4986_s0 = inlined_call_operand.vmem [shape: f32[8,16,128], index: 0, kind: input, shape index: {}]   ;;  %s4987_s1 = inlined_call_operand.vmem [shape: bf16[8,64,128], index: 1, kind: input, shape index: {}]   ;;  %s4988_s2 = inlined_call_operand.vmem [shape: bf16[8,64,64], index: 2, kind: input, shape index: {}]   ;;  %s4989_s3 = inlined_call_operand.vmem [shape: bf16[8,16,64], index: 3, kind: input, shape index: {}]   ;;  %s4990_s4 = inlined_call_operand.vmem [shape: bf16[3,128,128], index: 4, kind: input, shape index: {}]   ;;  %s4991_s5 = inlined_call_operand.vmem [shape: bf16[256,128], index: 5, kind: input, shape index: {}]   ;;  %s4992_s6 = inlined_call_operand.vmem [shape: f32[8,128], index: 6, kind: input, shape index: {}]   ;;  %s4993_s7 = inlined_call_operand.hbm [shape: f32[8,16,128], index: 7, kind: output, shape index: {}]  }
   0x1   :  { %14 = vsyncpa [#allocation3 + $0x1], 0  ;;  %s4280_s24 = smov 0   ;;  %s4282_s25 = smov 0  }
   0x2   :  { %s4284_s26 = smov 0   ;;  %s4286_s27 = smov 0  }
   0x3 LB: > { %s4301_s28 = sadd.s32 4294967295, %s4233_s27   ;;  %s3198_s29 = sadd.s32 4294967294, %s4233_s27   ;;  %s4233_s27 = sphi %s4286_s27, %s4999_s27   ;;  %s4229_s26 = sphi %s4284_s26, %s4998_s26   ;;  %s4225_s25 = sphi %s4282_s25, %s4997_s25   ;;  %s4221_s24 = sphi %s4280_s24, %s4996_s24  }
   0x4   : > { %s4305_s30 = sadd.s32 1, %s4233_s27   ;;  %s194_s8 = sadd.s32 1, %s4229_s26 }
   0x5   : > { %s191_s9 = ssub.s32 %s4233_s27, %s4305_s30  ;;  %p204_p0 = scmp.ne.s32.totalorder %s4229_s26, %s4225_s25 }
   0x6   : > { %p192_p1 = scmp.eq.s32.totalorder %s191_s9, 0  ;;  %p205_p2 = scmp.eq.s32.totalorder %s4301_s28, 1 }
   0x7   : > { %p210_p3 = scmp.ne.s32.totalorder %s4225_s25, %s4221_s24  ;;  %p211_p4 = scmp.eq.s32.totalorder %s3198_s29, 1 }
   0x8   : > { %s4316_s10 = scalar_select %p192_p1, %s4229_s26, %s194_s8  }
   0x9   : > { %p4318_p5 = por %p205_p2, %p204_p0  ;;  %p4322_p6 = por %p211_p4, %p210_p3 }
   0xa   : > { %p3201_p7 = scmp.ge.s32.totalorder %s4233_s27, 1  ;;  %p278_p8 = scmp.lt.s32.totalorder %s4233_s27, 3 }
   0xc   : > { %p279_p9 = pnand %p3201_p7, %p278_p8 }
   0xd   : > { %s3203_s15 = sshll.u32 (!%p279_p9), %s4301_s28, 2  ;;  %s326_s21 = sand.u32 (!%p279_p9), 1, %s4225_s25  }
   0xe   : > { %282 = sbr.rel (%p279_p9) target bundleno = 1883 (0x75b), region = 48  ;;  %p330_p10 = scmp.lt.s32.totalorder (!%p279_p9), %s3203_s15, 7 }
   0xf   : > { %s3202_s22 = sshll.u32 (!%p279_p9), %s326_s21, 6  ;;  %s4237_s17 = smov (!%p279_p9), [#allocation2]  }
  0x10   : > { %s4177_s18 = sshll.u32 (!%p279_p9), %s4237_s17, 4  ;;  %s4178_s18 = int_to_ptr.vmem [resolvable:$false] %s4177_s18 }
  0x11   : > { %s4179_s19 = scalar_lea.vmem (!%p279_p9), %s4178_s18, 2048 }
  0x13   : > { %v4080_v0 = vld [vmem:[%s4990_s4 + $0x38] sm:$0xff]   ;;  %v4081_v1 = vld [vmem:[%s4990_s4 + $0x30] sm:$0xff]   ;;  %s5001_s15 = smov (!%p330_p10, %s3203_s15), 7  ;;  %v4082_v2 = vld [vmem:[%s4990_s4 + $0x28] sm:$0xff]   ;;  %vm756_vm0 = vcmask 523264   ;;  %vm4236_vm1 = vmmov 0  }
  0x14   : > { %3653 = vmatprep.subr.bf16.mxu0 %v4080_v0  ;;  %s3420_s20 = sshll.u32 %s5001_s15, 5  ;;  %v4083_v3 = vld [vmem:[%s4990_s4 + $0x20] sm:$0xff]   ;;  %v4084_v5 = vld [vmem:[%s4990_s4 + $0x18] sm:$0xff]   ;;  %v4085_v6 = vld [vmem:[%s4990_s4 + $0x10] sm:$0xff]   ;;  %s3419_s29 = sshll.u32 %s5001_s15, 4 }
  0x15   : > { %3654 = vmatpush3.bf16.msra.mxu0 %v4080_v0  ;;  %s4344_s23 = scalar_lea.vmem %s4987_s1, %s3420_s20  ;;  %v4086_v7 = vld [vmem:[%s4990_s4 + $0x8] sm:$0xff]   ;;  %v4087_v8 = vld [vmem:[%s4990_s4] sm:$0xff]   ;;  %s4365_s8 = scalar_lea.vmem %s4988_s2, %s3420_s20  ;;  %v4120_v25 = vld [vmem:[%s4990_s4 + $0x78] sm:$0xff]  }
  0x16   : > { %3655 = vmatprep.subr.bf16.mxu0 %v4081_v1  ;;  %v4088_v4 = vld [vmem:[%s4344_s23] sm:$0xff]   ;;  %v4089_v9 = vld [vmem:[%s4344_s23 + $0x8] sm:$0xff]   ;;  %v4090_v10 = vld [vmem:[%s4344_s23 + $0x10] sm:$0xff]   ;;  %s4775_s9 = scalar_lea.vmem %s4986_s0, %s3419_s29  ;;  %s4925_s20 = scalar_lea.vmem [#allocation2], %s3202_s22 }
  0x17   : > { %3669 = vmatprep.mubr.bf16.mxu0 %v4088_v4  ;;  %v4091_v11 = vld [vmem:[%s4344_s23 + $0x18] sm:$0xff]   ;;  %v4092_v12 = vld [vmem:[%s4344_s23 + $0x20] sm:$0xff]   ;;  %v4093_v13 = vld [vmem:[%s4344_s23 + $0x28] sm:$0xff]  }
  0x18   : > { %v4094_v14 = vld [vmem:[%s4344_s23 + $0x30] sm:$0xff]   ;;  %v4095_v15 = vld [vmem:[%s4344_s23 + $0x38] sm:$0xff]   ;;  %v4096_v16 = vld [vmem:[%s4344_s23 + $0x40] sm:$0xff]  }
  0x19   : > { %3656 = vmatpush3.bf16.msra.mxu0 %v4081_v1  ;;  %v4097_v17 = vld [vmem:[%s4344_s23 + $0x48] sm:$0xff]   ;;  %v4098_v18 = vld [vmem:[%s4344_s23 + $0x50] sm:$0xff]   ;;  %v4099_v19 = vld [vmem:[%s4344_s23 + $0x58] sm:$0xff]  }
  0x1a   : > { %3657 = vmatprep.subr.bf16.mxu0 %v4082_v2  ;;  %v4100_v20 = vld [vmem:[%s4344_s23 + $0x60] sm:$0xff]   ;;  %v4101_v21 = vld [vmem:[%s4344_s23 + $0x68] sm:$0xff]   ;;  %v4102_v22 = vld [vmem:[%s4344_s23 + $0x70] sm:$0xff]  }
  0x1b   : > { %v4103_v23 = vld [vmem:[%s4344_s23 + $0x78] sm:$0xff]   ;;  %v4383_v24 = vld [vmem:[%s4365_s8] sm:$0xff]   ;;  %v4121_v26 = vld [vmem:[%s4990_s4 + $0x70] sm:$0xff]   ;;  %s4946_s23 = scalar_lea.sflag [#allocation3], %s326_s21 }
  0x1c   : > { %3709 = vmatprep.mubr.msk.bf16.mxu1 %vm756_vm0, %v4383_v24  ;;  %v4122_v27 = vld [vmem:[%s4990_s4 + $0x68] sm:$0xff]   ;;  %v4123_v28 = vld [vmem:[%s4990_s4 + $0x60] sm:$0xff]   ;;  %v4124_v29 = vld [vmem:[%s4990_s4 + $0x58] sm:$0xff]  }
  0x1d   : > { %3658 = vmatpush3.bf16.msra.mxu0 %v4082_v2  ;;  %v4403_v48 = vld [vmem:[%s4365_s8 + $0x8] sm:$0xff]   ;;  %v4406_v50 = vld [vmem:[%s4365_s8 + $0x10] sm:$0xff]   ;;  %v4413_v57 = vld [vmem:[%s4365_s8 + $0x18] sm:$0xff]  }
  0x1e   : > { %3659 = vmatprep.subr.bf16.mxu0 %v4083_v3  ;;  %v4416_v59 = vld [vmem:[%s4365_s8 + $0x20] sm:$0xff]   ;;  %v4423_v0 = vld [vmem:[%s4365_s8 + $0x28] sm:$0xff]   ;;  %v4426_v2 = vld [vmem:[%s4365_s8 + $0x30] sm:$0xff]  }
  0x21   : > { %3660 = vmatpush3.bf16.msra.mxu0 %v4083_v3 }
  0x22   : > { %3661 = vmatprep.subr.bf16.mxu0 %v4084_v5 }
  0x25   : > { %3662 = vmatpush3.bf16.msra.mxu0 %v4084_v5 }
  0x26   : > { %3663 = vmatprep.subr.bf16.mxu0 %v4085_v6 }
  0x29   : > { %3664 = vmatpush3.bf16.msra.mxu0 %v4085_v6 }
  0x2a   : > { %3665 = vmatprep.subr.bf16.mxu0 %v4086_v7 }
  0x2d   : > { %3666 = vmatpush3.bf16.msra.mxu0 %v4086_v7 }
  0x2e   : > { %3667 = vmatprep.subr.bf16.mxu0 %v4087_v8 }
  0x31   : > { %3668 = vmatpush3.bf16.msra.mxu0 %v4087_v8 }
  0x32   : > { %3765 = vmatprep.subr.bf16.mxu0 %v4120_v25 }
  0x34   : > { %3670 = vmatmul.mubr.bf16.vlgmr.msra.gmra.mxu0 %v4089_v9  ;;  %v4433_v9 = vld [vmem:[%s4365_s8 + $0x38] sm:$0xff]  }
  0x35   : > { %3673 = vmatprep.mubr.bf16.mxu0 %v4090_v10  ;;  %3766 = vmatpush3.bf16.msra.mxu0 %v4120_v25  ;;  %v4456_v25 = vld [vmem:[%s4365_s8 + $0x60] sm:$0xff]  }
  0x36   : > { %3767 = vmatprep.subr.bf16.mxu0 %v4121_v26 }
  0x39   : > { %3768 = vmatpush3.bf16.msra.mxu0 %v4121_v26 }
  0x3a   : > { %3769 = vmatprep.subr.bf16.mxu0 %v4122_v27 }
  0x3c   : > { %3674 = vmatmul.mubr.bf16.gmra.mxu0 %v4091_v11  ;;  %v4436_v11 = vld [vmem:[%s4365_s8 + $0x40] sm:$0xff]  }
  0x3d   : > { %3677 = vmatprep.mubr.bf16.mxu0 %v4092_v12  ;;  %3770 = vmatpush3.bf16.msra.mxu0 %v4122_v27  ;;  %v4463_v27 = vld [vmem:[%s4365_s8 + $0x68] sm:$0xff]  }
  0x3e   : > { %3771 = vmatprep.subr.bf16.mxu0 %v4123_v28 }
  0x41   : > { %3772 = vmatpush3.bf16.msra.mxu0 %v4123_v28  ;;  %v4466_v28 = vld [vmem:[%s4365_s8 + $0x70] sm:$0xff]  }
  0x42   : > { %3773 = vmatprep.subr.bf16.mxu0 %v4124_v29 }
  0x44   : > { %3678 = vmatmul.mubr.bf16.gmra.mxu0 %v4093_v13 }
  0x45   : > { %3681 = vmatprep.mubr.bf16.mxu0 %v4094_v14  ;;  %3774 = vmatpush3.bf16.msra.mxu0 %v4124_v29  ;;  %v4473_v29 = vld [vmem:[%s4365_s8 + $0x78] sm:$0xff]  }
  0x4c   : > { %3682 = vmatmul.mubr.bf16.gmra.mxu0 %v4095_v15 }
  0x4d   : > { %3685 = vmatprep.mubr.bf16.mxu0 %v4096_v16  ;;  %v4443_v16 = vld [vmem:[%s4365_s8 + $0x48] sm:$0xff]  }
  0x54   : > { %3686 = vmatmul.mubr.bf16.gmra.mxu0 %v4097_v17 }
  0x55   : > { %3689 = vmatprep.mubr.bf16.mxu0 %v4098_v18  ;;  %v4446_v18 = vld [vmem:[%s4365_s8 + $0x50] sm:$0xff]  }
  0x5c   : > { %3690 = vmatmul.mubr.bf16.gmra.mxu0 %v4099_v19 }
  0x5d   : > { %3693 = vmatprep.mubr.bf16.mxu0 %v4100_v20 }
  0x64   : > { %3694 = vmatmul.mubr.bf16.gmra.mxu0 %v4101_v21 }
  0x65   : > { %3697 = vmatprep.mubr.bf16.mxu0 %v4102_v22 }
  0x6c   : > { %3698 = vmatmul.mubr.bf16.gmra.mxu0 %v4103_v23  ;;  %v4453_v23 = vld [vmem:[%s4365_s8 + $0x58] sm:$0xff]  }
  0xf4   : > { %v3671_v30 = vpop.f32.mrf.mxu0 }
  0xf6   : > { %v585_v31 = vpop.f32.mrf.mxu0 }
  0xf8   : > { %v3672_v32 = vpop.f32.mrf.mxu0 }
  0xf9   : > { %v713_v42 = vpack.c.bf16 %v3672_v32, %v3671_v30  ;;  %v4125_v30 = vld [vmem:[%s4990_s4 + $0x50] sm:$0xff]   ;;  %v4127_v32 = vld [vmem:[%s4990_s4 + $0x40] sm:$0xff]  }
  0xfa   : > { %v588_v33 = vpop.f32.mrf.mxu0  ;;  %3775 = vmatprep.subr.bf16.mxu0 %v4125_v30 }
  0xfb   : > { %v712_v45 = vpack.c.bf16 %v588_v33, %v585_v31  ;;  %3776 = vmatpush3.bf16.msra.mxu0 %v4125_v30  ;;  %v4126_v31 = vld [vmem:[%s4990_s4 + $0x48] sm:$0xff]  }
  0xfc   : > { %v3675_v34 = vpop.f32.mrf.mxu0  ;;  %3777 = vmatprep.subr.bf16.mxu0 %v4126_v31 }
  0xfe   : > { %v601_v35 = vpop.f32.mrf.mxu0 }
  0xff   : > { %3778 = vmatpush3.bf16.msra.mxu0 %v4126_v31 }
 0x100   : > { %v3676_v36 = vpop.f32.mrf.mxu0  ;;  %3779 = vmatprep.subr.bf16.mxu0 %v4127_v32 }
 0x101   : > { %v715_v37 = vpack.c.bf16 %v3676_v36, %v3675_v34  ;;  %v4491_v34 = vld [vmem:[%s4992_s6] ss:$0 sm:$0xff] }
 0x102   : > { %v604_v38 = vpop.f32.mrf.mxu0 }
 0x103   : > { %v714_v39 = vpack.c.bf16 %v604_v38, %v601_v35  ;;  %3701 = vmatprep.subr.bf16.mxu1 %v715_v37  ;;  %3780 = vmatpush3.bf16.msra.mxu0 %v4127_v32 }
 0x104   : > { %v3679_v40 = vpop.f32.mrf.mxu0  ;;  %3702 = vmatpush3.bf16.msra.mxu1 %v715_v37 }
 0x105   : > { %3703 = vmatprep.subr.bf16.mxu1 %v714_v39 }
 0x106   : > { %v617_v41 = vpop.f32.mrf.mxu0 }
 0x108   : > { %v3680_v43 = vpop.f32.mrf.mxu0  ;;  %3704 = vmatpush3.bf16.msra.mxu1 %v714_v39 }
 0x109   : > { %3705 = vmatprep.subr.bf16.mxu1 %v713_v42  ;;  %v717_v56 = vpack.c.bf16 %v3680_v43, %v3679_v40 }
 0x10a   : > { %v620_v44 = vpop.f32.mrf.mxu0 }
 0x10b   : > { %v716_v61 = vpack.c.bf16 %v620_v44, %v617_v41 }
 0x10c   : > { %v3683_v46 = vpop.f32.mrf.mxu0  ;;  %3706 = vmatpush3.bf16.msra.mxu1 %v713_v42 }
 0x10d   : > { %3707 = vmatprep.subr.bf16.mxu1 %v712_v45 }
 0x10e   : > { %v633_v47 = vpop.f32.mrf.mxu0 }
 0x110   : > { %v3684_v49 = vpop.f32.mrf.mxu0  ;;  %3708 = vmatpush3.bf16.msra.mxu1 %v712_v45 }
 0x111   : > { %v719_v51 = vpack.c.bf16 %v3684_v49, %v3683_v46 }
 0x112   : > { %v636_v52 = vpop.f32.mrf.mxu0 }
 0x113   : > { %v718_v53 = vpack.c.bf16 %v636_v52, %v633_v47  ;;  %3710 = vmatmul.mubr.msk.bf16.vlgmr.msra.gmra.mxu1 %vm756_vm0, %v4403_v48  ;;  %3717 = vmatprep.subr.bf16.mxu1 %v719_v51 }
 0x114   : > { %v3687_v54 = vpop.f32.mrf.mxu0  ;;  %3718 = vmatpush3.bf16.msra.mxu1 %v719_v51  ;;  %3713 = vmatprep.mubr.msk.bf16.mxu1 %vm756_vm0, %v4406_v50 }
 0x115   : > { %3719 = vmatprep.subr.bf16.mxu1 %v718_v53 }
 0x116   : > { %v649_v55 = vpop.f32.mrf.mxu0 }
 0x118   : > { %v3688_v58 = vpop.f32.mrf.mxu0  ;;  %3720 = vmatpush3.bf16.msra.mxu1 %v718_v53 }
 0x119   : > { %3721 = vmatprep.subr.bf16.mxu1 %v717_v56  ;;  %v721_v8 = vpack.c.bf16 %v3688_v58, %v3687_v54 }
 0x11a   : > { %v652_v60 = vpop.f32.mrf.mxu0 }
 0x11b   : > { %3714 = vmatmul.mubr.msk.bf16.gmra.mxu1 %vm756_vm0, %v4413_v57  ;;  %v720_v13 = vpack.c.bf16 %v652_v60, %v649_v55 }
 0x11c   : > { %v3691_v62 = vpop.f32.mrf.mxu0  ;;  %3722 = vmatpush3.bf16.msra.mxu1 %v717_v56  ;;  %3725 = vmatprep.mubr.msk.bf16.mxu1 %vm756_vm0, %v4416_v59 }
 0x11d   : > { %3723 = vmatprep.subr.bf16.mxu1 %v716_v61 }
 0x11e   : > { %v665_v63 = vpop.f32.mrf.mxu0 }
 0x120   : > { %v3692_v1 = vpop.f32.mrf.mxu0  ;;  %3724 = vmatpush3.bf16.msra.mxu1 %v716_v61 }
 0x121   : > { %v723_v3 = vpack.c.bf16 %v3692_v1, %v3691_v62 }
 0x122   : > { %v668_v4 = vpop.f32.mrf.mxu0 }
 0x123   : > { %v722_v5 = vpack.c.bf16 %v668_v4, %v665_v63  ;;  %3726 = vmatmul.mubr.msk.bf16.vlgmr.msra.gmra.mxu1 %vm756_vm0, %v4423_v0  ;;  %3733 = vmatprep.subr.bf16.mxu1 %v723_v3 }
 0x124   : > { %v3695_v6 = vpop.f32.mrf.mxu0  ;;  %3734 = vmatpush3.bf16.msra.mxu1 %v723_v3  ;;  %3729 = vmatprep.mubr.msk.bf16.mxu1 %vm756_vm0, %v4426_v2 }
 0x125   : > { %3735 = vmatprep.subr.bf16.mxu1 %v722_v5 }
 0x126   : > { %v681_v7 = vpop.f32.mrf.mxu0 }
 0x128   : > { %v3696_v10 = vpop.f32.mrf.mxu0  ;;  %3736 = vmatpush3.bf16.msra.mxu1 %v722_v5 }
 0x129   : > { %3737 = vmatprep.subr.bf16.mxu1 %v721_v8  ;;  %v725_v22 = vpack.c.bf16 %v3696_v10, %v3695_v6 }
 0x12a   : > { %v684_v12 = vpop.f32.mrf.mxu0 }
 0x12b   : > { %3730 = vmatmul.mubr.msk.bf16.gmra.mxu1 %vm756_vm0, %v4433_v9  ;;  %v724_v26 = vpack.c.bf16 %v684_v12, %v681_v7 }
 0x12c   : > { %v3699_v14 = vpop.f32.mrf.mxu0  ;;  %3738 = vmatpush3.bf16.msra.mxu1 %v721_v8  ;;  %3741 = vmatprep.mubr.msk.bf16.mxu1 %vm756_vm0, %v4436_v11 }
 0x12d   : > { %3739 = vmatprep.subr.bf16.mxu1 %v720_v13 }
 0x12e   : > { %v697_v15 = vpop.f32.mrf.mxu0 }
 0x130   : > { %v3700_v17 = vpop.f32.mrf.mxu0  ;;  %3740 = vmatpush3.bf16.msra.mxu1 %v720_v13 }
 0x131   : > { %v727_v19 = vpack.c.bf16 %v3700_v17, %v3699_v14 }
 0x132   : > { %v700_v20 = vpop.f32.mrf.mxu0 }
 0x133   : > { %3742 = vmatmul.mubr.msk.bf16.vlgmr.msra.gmra.mxu1 %vm756_vm0, %v4443_v16  ;;  %3749 = vmatprep.subr.bf16.mxu1 %v727_v19  ;;  %v726_v21 = vpack.c.bf16 %v700_v20, %v697_v15 }
 0x134   : > { %3750 = vmatpush3.bf16.msra.mxu1 %v727_v19  ;;  %3745 = vmatprep.mubr.msk.bf16.mxu1 %vm756_vm0, %v4446_v18 }
 0x135   : > { %3751 = vmatprep.subr.bf16.mxu1 %v726_v21 }
 0x138   : > { %3752 = vmatpush3.bf16.msra.mxu1 %v726_v21 }
 0x139   : > { %3753 = vmatprep.subr.bf16.mxu1 %v725_v22 }
 0x13b   : > { %3746 = vmatmul.mubr.msk.bf16.gmra.mxu1 %vm756_vm0, %v4453_v23 }
 0x13c   : > { %3754 = vmatpush3.bf16.msra.mxu1 %v725_v22  ;;  %3757 = vmatprep.mubr.msk.bf16.mxu1 %vm756_vm0, %v4456_v25 }
 0x13d   : > { %3755 = vmatprep.subr.bf16.mxu1 %v724_v26 }
 0x140   : > { %3756 = vmatpush3.bf16.msra.mxu1 %v724_v26 }
 0x143   : > { %3758 = vmatmul.mubr.msk.bf16.vlgmr.msra.gmra.mxu1 %vm756_vm0, %v4463_v27 }
 0x144   : > { %3761 = vmatprep.mubr.msk.bf16.mxu1 %vm756_vm0, %v4466_v28 }
 0x14b   : > { %3762 = vmatmul.mubr.msk.bf16.gmra.mxu1 %vm756_vm0, %v4473_v29 }
 0x14c   : > { %3821 = vmatprep.mubr.msk.bf16.mxu1 %vm756_vm0, %v4383_v24 }
 0x1d3   : > { %v3711_v33 = vpop.f32.mrf.mxu1 }
 0x1d4   : > { %v1159_v38 = vadd.f32 %v3711_v33, %v4491_v34 }
 0x1d5   : > { %v803_v24 = vpop.f32.mrf.mxu1 }
 0x1d6   : > { %v1157_v36 = vadd.f32 %v4491_v34, %v803_v24  ;;  %v1191_v45 = vmax.f32 %v1159_v38, 0.0 }
 0x1d7   : > { %v3712_v35 = vpop.f32.mrf.mxu1 }
 0x1d8   : > { %v1160_v37 = vadd.f32 %v3712_v35, %v4491_v34  ;;  %v1189_v43 = vmax.f32 %v1157_v36, 0.0 }
 0x1d9   : > { %v806_v39 = vpop.f32.mrf.mxu1 }
 0x1da   : > { %v1158_v40 = vadd.f32 %v4491_v34, %v806_v39  ;;  %v1192_v41 = vmax.f32 %v1160_v37, 0.0 }
 0x1db   : > { %v3715_v42 = vpop.f32.mrf.mxu1 }
 0x1dc   : > { %v1190_v44 = vmax.f32 %v1158_v40, 0.0  ;;  %v1222_v49 = vpack.c.bf16 %v1192_v41, %v1191_v45  ;;  %v1163_v54 = vadd.f32 %v3715_v42, %v4491_v34 }
 0x1dd   : > { %v819_v46 = vpop.f32.mrf.mxu1 }
 0x1de   : > { %v1221_v47 = vpack.c.bf16 %v1190_v44, %v1189_v43  ;;  %v1161_v52 = vadd.f32 %v4491_v34, %v819_v46  ;;  %v1195_v63 = vmax.f32 %v1163_v54, 0.0 }
 0x1df   : > { %v3716_v51 = vpop.f32.mrf.mxu1 }
 0x1e0   : > { %v1164_v53 = vadd.f32 %v3716_v51, %v4491_v34  ;;  %3781 = vmatprep.mubr.bf16.mxu0 %v1221_v47  ;;  %v1193_v61 = vmax.f32 %v1161_v52, 0.0 }
 0x1e1   : > { %v822_v55 = vpop.f32.mrf.mxu1  ;;  %3782 = vmatmul.mubr.bf16.vlgmr.msra.gmra.mxu0 %v1222_v49 }
 0x1e2   : > { %v1162_v56 = vadd.f32 %v4491_v34, %v822_v55  ;;  %v1196_v58 = vmax.f32 %v1164_v53, 0.0 }
 0x1e3   : > { %v3727_v60 = vpop.f32.mrf.mxu1 }
 0x1e4   : > { %v1194_v62 = vmax.f32 %v1162_v56, 0.0  ;;  %v1224_v4 = vpack.c.bf16 %v1196_v58, %v1195_v63  ;;  %v1167_v8 = vadd.f32 %v3727_v60, %v4491_v34 }
 0x1e5   : > { %v909_v1 = vpop.f32.mrf.mxu1 }
 0x1e6   : > { %v1223_v3 = vpack.c.bf16 %v1194_v62, %v1193_v61  ;;  %v1165_v6 = vadd.f32 %v4491_v34, %v909_v1  ;;  %v1199_v19 = vmax.f32 %v1167_v8, 0.0 }
 0x1e7   : > { %v3728_v5 = vpop.f32.mrf.mxu1 }
 0x1e8   : > { %v1168_v7 = vadd.f32 %v3728_v5, %v4491_v34  ;;  %3785 = vmatprep.mubr.bf16.mxu0 %v1223_v3  ;;  %v1197_v15 = vmax.f32 %v1165_v6, 0.0 }
 0x1e9   : > { %v912_v10 = vpop.f32.mrf.mxu1  ;;  %3786 = vmatmul.mubr.bf16.gmra.mxu0 %v1224_v4 }
 0x1ea   : > { %v1166_v12 = vadd.f32 %v4491_v34, %v912_v10  ;;  %v1200_v13 = vmax.f32 %v1168_v7, 0.0 }
 0x1eb   : > { %v3731_v14 = vpop.f32.mrf.mxu1 }
 0x1ec   : > { %v1198_v17 = vmax.f32 %v1166_v12, 0.0  ;;  %v1226_v22 = vpack.c.bf16 %v1200_v13, %v1199_v19  ;;  %v1171_v32 = vadd.f32 %v3731_v14, %v4491_v34 }
 0x1ed   : > { %v925_v20 = vpop.f32.mrf.mxu1 }
 0x1ee   : > { %v1225_v21 = vpack.c.bf16 %v1198_v17, %v1197_v15  ;;  %v1169_v30 = vadd.f32 %v4491_v34, %v925_v20  ;;  %v1203_v39 = vmax.f32 %v1171_v32, 0.0 }
 0x1ef   : > { %v3732_v26 = vpop.f32.mrf.mxu1 }
 0x1f0   : > { %v1172_v31 = vadd.f32 %v3732_v26, %v4491_v34  ;;  %3789 = vmatprep.mubr.bf16.mxu0 %v1225_v21  ;;  %v1201_v37 = vmax.f32 %v1169_v30, 0.0 }
 0x1f1   : > { %v928_v33 = vpop.f32.mrf.mxu1  ;;  %3790 = vmatmul.mubr.bf16.gmra.mxu0 %v1226_v22 }
 0x1f2   : > { %v1170_v24 = vadd.f32 %v4491_v34, %v928_v33  ;;  %v1204_v35 = vmax.f32 %v1172_v31, 0.0 }
 0x1f3   : > { %v3743_v36 = vpop.f32.mrf.mxu1 }
 0x1f4   : > { %v1202_v38 = vmax.f32 %v1170_v24, 0.0  ;;  %v1228_v42 = vpack.c.bf16 %v1204_v35, %v1203_v39  ;;  %v1175_v46 = vadd.f32 %v3743_v36, %v4491_v34 }
 0x1f5   : > { %v1015_v40 = vpop.f32.mrf.mxu1 }
 0x1f6   : > { %v1227_v41 = vpack.c.bf16 %v1202_v38, %v1201_v37  ;;  %v1173_v44 = vadd.f32 %v4491_v34, %v1015_v40  ;;  %v1207_v55 = vmax.f32 %v1175_v46, 0.0 }
 0x1f7   : > { %v3744_v43 = vpop.f32.mrf.mxu1 }
 0x1f8   : > { %v1176_v45 = vadd.f32 %v3744_v43, %v4491_v34  ;;  %3793 = vmatprep.mubr.bf16.mxu0 %v1227_v41  ;;  %v1205_v53 = vmax.f32 %v1173_v44, 0.0 }
 0x1f9   : > { %v1018_v47 = vpop.f32.mrf.mxu1  ;;  %3794 = vmatmul.mubr.bf16.gmra.mxu0 %v1228_v42 }
 0x1fa   : > { %v1174_v49 = vadd.f32 %v4491_v34, %v1018_v47  ;;  %v1208_v51 = vmax.f32 %v1176_v45, 0.0 }
 0x1fb   : > { %v3747_v52 = vpop.f32.mrf.mxu1 }
 0x1fc   : > { %v1206_v54 = vmax.f32 %v1174_v49, 0.0  ;;  %v1230_v60 = vpack.c.bf16 %v1208_v51, %v1207_v55  ;;  %v1179_v1 = vadd.f32 %v3747_v52, %v4491_v34  ;;  %v4128_v51 = vld [vmem:[%s4990_s4 + $0xb8] sm:$0xff]   ;;  %v4129_v52 = vld [vmem:[%s4990_s4 + $0xb0] sm:$0xff]  }
 0x1fd   : > { %v1031_v56 = vpop.f32.mrf.mxu1  ;;  %3877 = vmatprep.subr.bf16.mxu0 %v4128_v51 }
 0x1fe   : > { %v1229_v58 = vpack.c.bf16 %v1206_v54, %v1205_v53  ;;  %v1177_v62 = vadd.f32 %v4491_v34, %v1031_v56  ;;  %v1211_v10 = vmax.f32 %v1179_v1, 0.0  ;;  %3878 = vmatpush3.bf16.msra.mxu0 %v4128_v51  ;;  %v4131_v53 = vld [vmem:[%s4990_s4 + $0xa0] sm:$0xff]   ;;  %v4132_v54 = vld [vmem:[%s4990_s4 + $0x98] sm:$0xff]  }
 0x1ff   : > { %v3748_v61 = vpop.f32.mrf.mxu1  ;;  %3879 = vmatprep.subr.bf16.mxu0 %v4129_v52 }
 0x200   : > { %v1180_v63 = vadd.f32 %v3748_v61, %v4491_v34  ;;  %3797 = vmatprep.mubr.bf16.mxu0 %v1229_v58  ;;  %v1209_v7 = vmax.f32 %v1177_v62, 0.0 }
 0x201   : > { %v1034_v3 = vpop.f32.mrf.mxu1  ;;  %3798 = vmatmul.mubr.bf16.gmra.mxu0 %v1230_v60 }
 0x202   : > { %v1178_v4 = vadd.f32 %v4491_v34, %v1034_v3  ;;  %v1212_v5 = vmax.f32 %v1180_v63, 0.0  ;;  %3880 = vmatpush3.bf16.msra.mxu0 %v4129_v52 }
 0x203   : > { %v3759_v6 = vpop.f32.mrf.mxu1 }
 0x204   : > { %v1210_v8 = vmax.f32 %v1178_v4, 0.0  ;;  %v1232_v14 = vpack.c.bf16 %v1212_v5, %v1211_v10  ;;  %v1183_v20 = vadd.f32 %v3759_v6, %v4491_v34 }
 0x205   : > { %v1121_v12 = vpop.f32.mrf.mxu1 }
 0x206   : > { %v1231_v13 = vpack.c.bf16 %v1210_v8, %v1209_v7  ;;  %v1181_v17 = vadd.f32 %v4491_v34, %v1121_v12  ;;  %v1215_v33 = vmax.f32 %v1183_v20, 0.0 }
 0x207   : > { %v3760_v15 = vpop.f32.mrf.mxu1 }
 0x208   : > { %v1184_v19 = vadd.f32 %v3760_v15, %v4491_v34  ;;  %3801 = vmatprep.mubr.bf16.mxu0 %v1231_v13  ;;  %v1213_v31 = vmax.f32 %v1181_v17, 0.0 }
 0x209   : > { %v1124_v21 = vpop.f32.mrf.mxu1  ;;  %3802 = vmatmul.mubr.bf16.gmra.mxu0 %v1232_v14 }
 0x20a   : > { %v1182_v22 = vadd.f32 %v4491_v34, %v1124_v21  ;;  %v1216_v26 = vmax.f32 %v1184_v19, 0.0 }
 0x20b   : > { %v3763_v30 = vpop.f32.mrf.mxu1 }
 0x20c   : > { %v1214_v32 = vmax.f32 %v1182_v22, 0.0  ;;  %v1234_v36 = vpack.c.bf16 %v1216_v26, %v1215_v33  ;;  %v1187_v40 = vadd.f32 %v3763_v30, %v4491_v34 }
 0x20d   : > { %v1137_v24 = vpop.f32.mrf.mxu1 }
 0x20e   : > { %v1233_v35 = vpack.c.bf16 %v1214_v32, %v1213_v31  ;;  %v1185_v38 = vadd.f32 %v4491_v34, %v1137_v24  ;;  %v1219_v46 = vmax.f32 %v1187_v40, 0.0 }
 0x20f   : > { %v3764_v37 = vpop.f32.mrf.mxu1 }
 0x210   : > { %v1188_v39 = vadd.f32 %v3764_v37, %v4491_v34  ;;  %3805 = vmatprep.mubr.bf16.mxu0 %v1233_v35  ;;  %v1217_v44 = vmax.f32 %v1185_v38, 0.0 }
 0x211   : > { %v1140_v41 = vpop.f32.mrf.mxu1  ;;  %3806 = vmatmul.mubr.bf16.gmra.mxu0 %v1234_v36 }
 0x212   : > { %v1186_v42 = vadd.f32 %v4491_v34, %v1140_v41  ;;  %v1220_v43 = vmax.f32 %v1188_v39, 0.0  ;;  %v4130_v34 = vld [vmem:[%s4990_s4 + $0xa8] sm:$0xff]  }
 0x213   : > { %3881 = vmatprep.subr.bf16.mxu0 %v4130_v34 }
 0x214   : > { %v1218_v45 = vmax.f32 %v1186_v42, 0.0  ;;  %v1236_v49 = vpack.c.bf16 %v1220_v43, %v1219_v46  ;;  %3882 = vmatpush3.bf16.msra.mxu0 %v4130_v34 }
 0x215   : > { %3883 = vmatprep.subr.bf16.mxu0 %v4131_v53 }
 0x216   : > { %v1235_v47 = vpack.c.bf16 %v1218_v45, %v1217_v44 }
 0x218   : > { %3809 = vmatprep.mubr.bf16.mxu0 %v1235_v47  ;;  %3884 = vmatpush3.bf16.msra.mxu0 %v4131_v53 }
 0x219   : > { %3810 = vmatmul.mubr.bf16.gmra.mxu0 %v1236_v49  ;;  %3885 = vmatprep.subr.bf16.mxu0 %v4132_v54 }
 0x21c   : > { %3886 = vmatpush3.bf16.msra.mxu0 %v4132_v54  ;;  %v4133_v54 = vld [vmem:[%s4990_s4 + $0x90] sm:$0xff]  }
 0x21d   : > { %3887 = vmatprep.subr.bf16.mxu0 %v4133_v54 }
 0x220   : > { %3888 = vmatpush3.bf16.msra.mxu0 %v4133_v54 }
 0x2a1   : > { %v3783_v55 = vpop.f32.mrf.mxu0 }
 0x2a3   : > { %v1336_v56 = vpop.f32.mrf.mxu0 }
 0x2a5   : > { %v3784_v58 = vpop.f32.mrf.mxu0 }
 0x2a6   : > { %v1464_v7 = vpack.c.bf16 %v3784_v58, %v3783_v55  ;;  %v4134_v55 = vld [vmem:[%s4990_s4 + $0x88] sm:$0xff]  }
 0x2a7   : > { %v1339_v60 = vpop.f32.mrf.mxu0  ;;  %3889 = vmatprep.subr.bf16.mxu0 %v4134_v55 }
 0x2a8   : > { %v1463_v12 = vpack.c.bf16 %v1339_v60, %v1336_v56  ;;  %3890 = vmatpush3.bf16.msra.mxu0 %v4134_v55  ;;  %v4135_v56 = vld [vmem:[%s4990_s4 + $0x80] sm:$0xff]  }
 0x2a9   : > { %v3787_v61 = vpop.f32.mrf.mxu0  ;;  %3891 = vmatprep.subr.bf16.mxu0 %v4135_v56  ;;  %v4584_v60 = vld [vmem:[%s4992_s6 + $0x1] ss:$0 sm:$0xff] }
 0x2ab   : > { %v1352_v62 = vpop.f32.mrf.mxu0 }
 0x2ac   : > { %3892 = vmatpush3.bf16.msra.mxu0 %v4135_v56 }
 0x2ad   : > { %v3788_v63 = vpop.f32.mrf.mxu0 }
 0x2ae   : > { %v1466_v1 = vpack.c.bf16 %v3788_v63, %v3787_v61 }
 0x2af   : > { %v1355_v3 = vpop.f32.mrf.mxu0 }
 0x2b0   : > { %v1465_v4 = vpack.c.bf16 %v1355_v3, %v1352_v62  ;;  %3813 = vmatprep.subr.bf16.mxu1 %v1466_v1 }
 0x2b1   : > { %v3791_v5 = vpop.f32.mrf.mxu0  ;;  %3814 = vmatpush3.bf16.msra.mxu1 %v1466_v1 }
 0x2b2   : > { %3815 = vmatprep.subr.bf16.mxu1 %v1465_v4 }
 0x2b3   : > { %v1368_v6 = vpop.f32.mrf.mxu0 }
 0x2b5   : > { %v3792_v8 = vpop.f32.mrf.mxu0  ;;  %3816 = vmatpush3.bf16.msra.mxu1 %v1465_v4 }
 0x2b6   : > { %3817 = vmatprep.subr.bf16.mxu1 %v1464_v7  ;;  %v1468_v26 = vpack.c.bf16 %v3792_v8, %v3791_v5 }
 0x2b7   : > { %v1371_v10 = vpop.f32.mrf.mxu0 }
 0x2b8   : > { %v1467_v32 = vpack.c.bf16 %v1371_v10, %v1368_v6 }
 0x2b9   : > { %v3795_v13 = vpop.f32.mrf.mxu0  ;;  %3818 = vmatpush3.bf16.msra.mxu1 %v1464_v7 }
 0x2ba   : > { %3819 = vmatprep.subr.bf16.mxu1 %v1463_v12 }
 0x2bb   : > { %v1384_v14 = vpop.f32.mrf.mxu0 }
 0x2bd   : > { %v3796_v15 = vpop.f32.mrf.mxu0  ;;  %3820 = vmatpush3.bf16.msra.mxu1 %v1463_v12 }
 0x2be   : > { %v1470_v17 = vpack.c.bf16 %v3796_v15, %v3795_v13 }
 0x2bf   : > { %v1387_v19 = vpop.f32.mrf.mxu0 }
 0x2c0   : > { %v1469_v20 = vpack.c.bf16 %v1387_v19, %v1384_v14  ;;  %3822 = vmatmul.mubr.msk.bf16.vlgmr.msra.gmra.mxu1 %vm756_vm0, %v4403_v48  ;;  %3829 = vmatprep.subr.bf16.mxu1 %v1470_v17 }
 0x2c1   : > { %v3799_v21 = vpop.f32.mrf.mxu0  ;;  %3830 = vmatpush3.bf16.msra.mxu1 %v1470_v17  ;;  %3825 = vmatprep.mubr.msk.bf16.mxu1 %vm756_vm0, %v4406_v50 }
 0x2c2   : > { %3831 = vmatprep.subr.bf16.mxu1 %v1469_v20 }
 0x2c3   : > { %v1400_v22 = vpop.f32.mrf.mxu0 }
 0x2c5   : > { %v3800_v30 = vpop.f32.mrf.mxu0  ;;  %3832 = vmatpush3.bf16.msra.mxu1 %v1469_v20 }
 0x2c6   : > { %3833 = vmatprep.subr.bf16.mxu1 %v1468_v26  ;;  %v1472_v41 = vpack.c.bf16 %v3800_v30, %v3799_v21 }
 0x2c7   : > { %v1403_v31 = vpop.f32.mrf.mxu0 }
 0x2c8   : > { %3826 = vmatmul.mubr.msk.bf16.gmra.mxu1 %vm756_vm0, %v4413_v57  ;;  %v1471_v44 = vpack.c.bf16 %v1403_v31, %v1400_v22 }
 0x2c9   : > { %v3803_v33 = vpop.f32.mrf.mxu0  ;;  %3834 = vmatpush3.bf16.msra.mxu1 %v1468_v26  ;;  %3837 = vmatprep.mubr.msk.bf16.mxu1 %vm756_vm0, %v4416_v59 }
 0x2ca   : > { %3835 = vmatprep.subr.bf16.mxu1 %v1467_v32 }
 0x2cb   : > { %v1416_v24 = vpop.f32.mrf.mxu0 }
 0x2cd   : > { %v3804_v35 = vpop.f32.mrf.mxu0  ;;  %3836 = vmatpush3.bf16.msra.mxu1 %v1467_v32 }
 0x2ce   : > { %v1474_v36 = vpack.c.bf16 %v3804_v35, %v3803_v33 }
 0x2cf   : > { %v1419_v37 = vpop.f32.mrf.mxu0 }
 0x2d0   : > { %v1473_v38 = vpack.c.bf16 %v1419_v37, %v1416_v24  ;;  %3838 = vmatmul.mubr.msk.bf16.vlgmr.msra.gmra.mxu1 %vm756_vm0, %v4423_v0  ;;  %3845 = vmatprep.subr.bf16.mxu1 %v1474_v36 }
 0x2d1   : > { %v3807_v39 = vpop.f32.mrf.mxu0  ;;  %3846 = vmatpush3.bf16.msra.mxu1 %v1474_v36  ;;  %3841 = vmatprep.mubr.msk.bf16.mxu1 %vm756_vm0, %v4426_v2 }
 0x2d2   : > { %3847 = vmatprep.subr.bf16.mxu1 %v1473_v38 }
 0x2d3   : > { %v1432_v40 = vpop.f32.mrf.mxu0 }
 0x2d5   : > { %v3808_v42 = vpop.f32.mrf.mxu0  ;;  %3848 = vmatpush3.bf16.msra.mxu1 %v1473_v38 }
 0x2d6   : > { %3849 = vmatprep.subr.bf16.mxu1 %v1472_v41  ;;  %v1476_v34 = vpack.c.bf16 %v3808_v42, %v3807_v39 }
 0x2d7   : > { %v1435_v43 = vpop.f32.mrf.mxu0 }
 0x2d8   : > { %3842 = vmatmul.mubr.msk.bf16.gmra.mxu1 %vm756_vm0, %v4433_v9  ;;  %v1475_v53 = vpack.c.bf16 %v1435_v43, %v1432_v40 }
 0x2d9   : > { %v3811_v45 = vpop.f32.mrf.mxu0  ;;  %3850 = vmatpush3.bf16.msra.mxu1 %v1472_v41  ;;  %3853 = vmatprep.mubr.msk.bf16.mxu1 %vm756_vm0, %v4436_v11 }
 0x2da   : > { %3851 = vmatprep.subr.bf16.mxu1 %v1471_v44 }
 0x2db   : > { %v1448_v46 = vpop.f32.mrf.mxu0 }
 0x2dd   : > { %v3812_v47 = vpop.f32.mrf.mxu0  ;;  %3852 = vmatpush3.bf16.msra.mxu1 %v1471_v44 }
 0x2de   : > { %v1478_v49 = vpack.c.bf16 %v3812_v47, %v3811_v45 }
 0x2df   : > { %v1451_v51 = vpop.f32.mrf.mxu0 }
 0x2e0   : > { %3854 = vmatmul.mubr.msk.bf16.vlgmr.msra.gmra.mxu1 %vm756_vm0, %v4443_v16  ;;  %3861 = vmatprep.subr.bf16.mxu1 %v1478_v49  ;;  %v1477_v52 = vpack.c.bf16 %v1451_v51, %v1448_v46 }
 0x2e1   : > { %3862 = vmatpush3.bf16.msra.mxu1 %v1478_v49  ;;  %3857 = vmatprep.mubr.msk.bf16.mxu1 %vm756_vm0, %v4446_v18 }
 0x2e2   : > { %3863 = vmatprep.subr.bf16.mxu1 %v1477_v52 }
 0x2e5   : > { %3864 = vmatpush3.bf16.msra.mxu1 %v1477_v52 }
 0x2e6   : > { %3865 = vmatprep.subr.bf16.mxu1 %v1476_v34 }
 0x2e8   : > { %3858 = vmatmul.mubr.msk.bf16.gmra.mxu1 %vm756_vm0, %v4453_v23 }
 0x2e9   : > { %3866 = vmatpush3.bf16.msra.mxu1 %v1476_v34  ;;  %3869 = vmatprep.mubr.msk.bf16.mxu1 %vm756_vm0, %v4456_v25 }
 0x2ea   : > { %3867 = vmatprep.subr.bf16.mxu1 %v1475_v53 }
 0x2ed   : > { %3868 = vmatpush3.bf16.msra.mxu1 %v1475_v53 }
 0x2f0   : > { %3870 = vmatmul.mubr.msk.bf16.vlgmr.msra.gmra.mxu1 %vm756_vm0, %v4463_v27 }
 0x2f1   : > { %3873 = vmatprep.mubr.msk.bf16.mxu1 %vm756_vm0, %v4466_v28 }
 0x2f8   : > { %3874 = vmatmul.mubr.msk.bf16.gmra.mxu1 %vm756_vm0, %v4473_v29 }
 0x2f9   : > { %3949 = vmatprep.mubr.msk.bf16.mxu1 %vm756_vm0, %v4416_v59 }
 0x380   : > { %v3823_v58 = vpop.f32.mrf.mxu1 }
 0x381   : > { %v1746_v1 = vadd.f32 %v3823_v58, %v4584_v60 }
 0x382   : > { %v1513_v59 = vpop.f32.mrf.mxu1 }
 0x383   : > { %v1744_v62 = vadd.f32 %v4584_v60, %v1513_v59  ;;  %v1778_v10 = vmax.f32 %v1746_v1, 0.0 }
 0x384   : > { %v3824_v61 = vpop.f32.mrf.mxu1 }
 0x385   : > { %v1747_v63 = vadd.f32 %v3824_v61, %v4584_v60  ;;  %v1776_v7 = vmax.f32 %v1744_v62, 0.0 }
 0x386   : > { %v1516_v3 = vpop.f32.mrf.mxu1 }
 0x387   : > { %v1745_v4 = vadd.f32 %v4584_v60, %v1516_v3  ;;  %v1779_v5 = vmax.f32 %v1747_v63, 0.0 }
 0x388   : > { %v3827_v6 = vpop.f32.mrf.mxu1 }
 0x389   : > { %v1777_v8 = vmax.f32 %v1745_v4, 0.0  ;;  %v1809_v14 = vpack.c.bf16 %v1779_v5, %v1778_v10  ;;  %v1750_v20 = vadd.f32 %v3827_v6, %v4584_v60 }
 0x38a   : > { %v1529_v12 = vpop.f32.mrf.mxu1 }
 0x38b   : > { %v1808_v13 = vpack.c.bf16 %v1777_v8, %v1776_v7  ;;  %v1748_v17 = vadd.f32 %v4584_v60, %v1529_v12  ;;  %v1782_v33 = vmax.f32 %v1750_v20, 0.0 }
 0x38c   : > { %v3828_v15 = vpop.f32.mrf.mxu1 }
 0x38d   : > { %v1751_v19 = vadd.f32 %v3828_v15, %v4584_v60  ;;  %3893 = vmatprep.mubr.bf16.mxu0 %v1808_v13  ;;  %v1780_v31 = vmax.f32 %v1748_v17, 0.0 }
 0x38e   : > { %v1532_v21 = vpop.f32.mrf.mxu1  ;;  %3894 = vmatmul.mubr.bf16.vlgmr.msra.gmra.mxu0 %v1809_v14 }
 0x38f   : > { %v1749_v22 = vadd.f32 %v4584_v60, %v1532_v21  ;;  %v1783_v26 = vmax.f32 %v1751_v19, 0.0 }
 0x390   : > { %v3839_v30 = vpop.f32.mrf.mxu1 }
 0x391   : > { %v1781_v32 = vmax.f32 %v1749_v22, 0.0  ;;  %v1811_v36 = vpack.c.bf16 %v1783_v26, %v1782_v33  ;;  %v1754_v40 = vadd.f32 %v3839_v30, %v4584_v60 }
 0x392   : > { %v1578_v24 = vpop.f32.mrf.mxu1 }
 0x393   : > { %v1810_v35 = vpack.c.bf16 %v1781_v32, %v1780_v31  ;;  %v1752_v38 = vadd.f32 %v4584_v60, %v1578_v24  ;;  %v1786_v47 = vmax.f32 %v1754_v40, 0.0 }
 0x394   : > { %v3840_v37 = vpop.f32.mrf.mxu1 }
 0x395   : > { %v1755_v39 = vadd.f32 %v3840_v37, %v4584_v60  ;;  %3897 = vmatprep.mubr.bf16.mxu0 %v1810_v35  ;;  %v1784_v45 = vmax.f32 %v1752_v38, 0.0 }
 0x396   : > { %v1581_v41 = vpop.f32.mrf.mxu1  ;;  %3898 = vmatmul.mubr.bf16.gmra.mxu0 %v1811_v36 }
 0x397   : > { %v1753_v42 = vadd.f32 %v4584_v60, %v1581_v41  ;;  %v1787_v43 = vmax.f32 %v1755_v39, 0.0 }
 0x398   : > { %v3843_v44 = vpop.f32.mrf.mxu1 }
 0x399   : > { %v1785_v46 = vmax.f32 %v1753_v42, 0.0  ;;  %v1813_v52 = vpack.c.bf16 %v1787_v43, %v1786_v47  ;;  %v1758_v55 = vadd.f32 %v3843_v44, %v4584_v60 }
 0x39a   : > { %v1594_v49 = vpop.f32.mrf.mxu1 }
 0x39b   : > { %v1812_v51 = vpack.c.bf16 %v1785_v46, %v1784_v45  ;;  %v1756_v53 = vadd.f32 %v4584_v60, %v1594_v49  ;;  %v1790_v1 = vmax.f32 %v1758_v55, 0.0 }
 0x39c   : > { %v3844_v34 = vpop.f32.mrf.mxu1 }
 0x39d   : > { %v1759_v54 = vadd.f32 %v3844_v34, %v4584_v60  ;;  %3901 = vmatprep.mubr.bf16.mxu0 %v1812_v51  ;;  %v1788_v62 = vmax.f32 %v1756_v53, 0.0 }
 0x39e   : > { %v1597_v56 = vpop.f32.mrf.mxu1  ;;  %3902 = vmatmul.mubr.bf16.gmra.mxu0 %v1813_v52 }
 0x39f   : > { %v1757_v58 = vadd.f32 %v4584_v60, %v1597_v56  ;;  %v1791_v59 = vmax.f32 %v1759_v54, 0.0 }
 0x3a0   : > { %v3855_v61 = vpop.f32.mrf.mxu1 }
 0x3a1   : > { %v1789_v63 = vmax.f32 %v1757_v58, 0.0  ;;  %v1815_v5 = vpack.c.bf16 %v1791_v59, %v1790_v1  ;;  %v1762_v10 = vadd.f32 %v3855_v61, %v4584_v60 }
 0x3a2   : > { %v1643_v3 = vpop.f32.mrf.mxu1 }
 0x3a3   : > { %v1814_v4 = vpack.c.bf16 %v1789_v63, %v1788_v62  ;;  %v1760_v7 = vadd.f32 %v4584_v60, %v1643_v3  ;;  %v1794_v20 = vmax.f32 %v1762_v10, 0.0 }
 0x3a4   : > { %v3856_v6 = vpop.f32.mrf.mxu1 }
 0x3a5   : > { %v1763_v8 = vadd.f32 %v3856_v6, %v4584_v60  ;;  %3905 = vmatprep.mubr.bf16.mxu0 %v1814_v4  ;;  %v1792_v17 = vmax.f32 %v1760_v7, 0.0 }
 0x3a6   : > { %v1646_v12 = vpop.f32.mrf.mxu1  ;;  %3906 = vmatmul.mubr.bf16.gmra.mxu0 %v1815_v5 }
 0x3a7   : > { %v1761_v13 = vadd.f32 %v4584_v60, %v1646_v12  ;;  %v1795_v14 = vmax.f32 %v1763_v8, 0.0 }
 0x3a8   : > { %v3859_v15 = vpop.f32.mrf.mxu1 }
 0x3a9   : > { %v1793_v19 = vmax.f32 %v1761_v13, 0.0  ;;  %v1817_v26 = vpack.c.bf16 %v1795_v14, %v1794_v20  ;;  %v1766_v33 = vadd.f32 %v3859_v15, %v4584_v60  ;;  %v4172_v13 = vld [vmem:[%s4365_s8] sm:$0xff]   ;;  %s3422_s8 = sshll.u32 %s5001_s15, 3  ;;  %s3100_s15 = sshll.u32 %s4925_s20, 4  ;;  %s4941_s15 = int_to_ptr.vmem [resolvable:$true] %s3100_s15 }
 0x3aa   : > { %v1659_v21 = vpop.f32.mrf.mxu1  ;;  %s4654_s13 = scalar_lea.vmem %s4989_s3, %s3422_s8  ;;  %p4180_p0 = scmp.lt.s32.totalorder %s4941_s15, %s4178_s18 }
 0x3ab   : > { %v1816_v22 = vpack.c.bf16 %v1793_v19, %v1792_v17  ;;  %v1764_v31 = vadd.f32 %v4584_v60, %v1659_v21  ;;  %v1798_v40 = vmax.f32 %v1766_v33, 0.0 }
 0x3ac   : > { %v3860_v30 = vpop.f32.mrf.mxu1 }
 0x3ad   : > { %v1767_v32 = vadd.f32 %v3860_v30, %v4584_v60  ;;  %3909 = vmatprep.mubr.bf16.mxu0 %v1816_v22  ;;  %v1796_v38 = vmax.f32 %v1764_v31, 0.0 }
 0x3ae   : > { %v1662_v24 = vpop.f32.mrf.mxu1  ;;  %3910 = vmatmul.mubr.bf16.gmra.mxu0 %v1817_v26 }
 0x3af   : > { %v1765_v35 = vadd.f32 %v4584_v60, %v1662_v24  ;;  %v1799_v36 = vmax.f32 %v1767_v32, 0.0 }
 0x3b0   : > { %v3871_v37 = vpop.f32.mrf.mxu1 }
 0x3b1   : > { %v1797_v39 = vmax.f32 %v1765_v35, 0.0  ;;  %v1819_v43 = vpack.c.bf16 %v1799_v36, %v1798_v40  ;;  %v1770_v47 = vadd.f32 %v3871_v37, %v4584_v60 }
 0x3b2   : > { %v1708_v41 = vpop.f32.mrf.mxu1 }
 0x3b3   : > { %v1818_v42 = vpack.c.bf16 %v1797_v39, %v1796_v38  ;;  %v1768_v45 = vadd.f32 %v4584_v60, %v1708_v41  ;;  %v1802_v55 = vmax.f32 %v1770_v47, 0.0 }
 0x3b4   : > { %v3872_v44 = vpop.f32.mrf.mxu1 }
 0x3b5   : > { %v1771_v46 = vadd.f32 %v3872_v44, %v4584_v60  ;;  %3913 = vmatprep.mubr.bf16.mxu0 %v1818_v42  ;;  %v1800_v53 = vmax.f32 %v1768_v45, 0.0 }
 0x3b6   : > { %v1711_v49 = vpop.f32.mrf.mxu1  ;;  %3914 = vmatmul.mubr.bf16.gmra.mxu0 %v1819_v43 }
 0x3b7   : > { %v1769_v51 = vadd.f32 %v4584_v60, %v1711_v49  ;;  %v1803_v52 = vmax.f32 %v1771_v46, 0.0 }
 0x3b8   : > { %v3875_v34 = vpop.f32.mrf.mxu1 }
 0x3b9   : > { %v1801_v54 = vmax.f32 %v1769_v51, 0.0  ;;  %v1821_v59 = vpack.c.bf16 %v1803_v52, %v1802_v55  ;;  %v1774_v1 = vadd.f32 %v3875_v34, %v4584_v60 }
 0x3ba   : > { %v1724_v56 = vpop.f32.mrf.mxu1 }
 0x3bb   : > { %v1820_v58 = vpack.c.bf16 %v1801_v54, %v1800_v53  ;;  %v1772_v62 = vadd.f32 %v4584_v60, %v1724_v56  ;;  %v1806_v8 = vmax.f32 %v1774_v1, 0.0 }
 0x3bc   : > { %v3876_v61 = vpop.f32.mrf.mxu1 }
 0x3bd   : > { %v1775_v63 = vadd.f32 %v3876_v61, %v4584_v60  ;;  %3917 = vmatprep.mubr.bf16.mxu0 %v1820_v58  ;;  %v1804_v6 = vmax.f32 %v1772_v62, 0.0 }
 0x3be   : > { %v1727_v3 = vpop.f32.mrf.mxu1  ;;  %3918 = vmatmul.mubr.bf16.gmra.mxu0 %v1821_v59 }
 0x3bf   : > { %v1773_v4 = vadd.f32 %v4584_v60, %v1727_v3  ;;  %v1807_v5 = vmax.f32 %v1775_v63, 0.0 }
 0x3c1   : > { %v1805_v7 = vmax.f32 %v1773_v4, 0.0  ;;  %v1823_v12 = vpack.c.bf16 %v1807_v5, %v1806_v8 }
 0x3c3   : > { %v1822_v10 = vpack.c.bf16 %v1805_v7, %v1804_v6 }
 0x3c5   : > { %3921 = vmatprep.mubr.bf16.mxu0 %v1822_v10 }
 0x3c6   : > { %3922 = vmatmul.mubr.bf16.gmra.mxu0 %v1823_v12 }
 0x3c7   : > { %3933 = vmatprep.mubr.msk.bf16.mxu0 %vm756_vm0, %v4172_v13 }
 0x44e   : > { %v3895_v14 = vpop.f32.mrf.mxu0 }
 0x450   : > { %v1923_v15 = vpop.f32.mrf.mxu0 }
 0x452   : > { %v3896_v17 = vpop.f32.mrf.mxu0 }
 0x453   : > { %v2051_v33 = vpack.c.bf16 %v3896_v17, %v3895_v14 }
 0x454   : > { %v1926_v19 = vpop.f32.mrf.mxu0 }
 0x455   : > { %v2050_v36 = vpack.c.bf16 %v1926_v19, %v1923_v15 }
 0x456   : > { %v3899_v20 = vpop.f32.mrf.mxu0 }
 0x458   : > { %v1939_v21 = vpop.f32.mrf.mxu0 }
 0x45a   : > { %v3900_v22 = vpop.f32.mrf.mxu0 }
 0x45b   : > { %v2053_v26 = vpack.c.bf16 %v3900_v22, %v3899_v20 }
 0x45c   : > { %v1942_v60 = vpop.f32.mrf.mxu0 }
 0x45d   : > { %v2052_v30 = vpack.c.bf16 %v1942_v60, %v1939_v21  ;;  %3925 = vmatprep.subr.bf16.mxu0 %v2053_v26 }
 0x45e   : > { %v3903_v31 = vpop.f32.mrf.mxu0  ;;  %3926 = vmatpush3.bf16.msra.mxu0 %v2053_v26 }
 0x45f   : > { %3927 = vmatprep.subr.bf16.mxu0 %v2052_v30 }
 0x460   : > { %v1955_v32 = vpop.f32.mrf.mxu0 }
 0x462   : > { %v3904_v24 = vpop.f32.mrf.mxu0  ;;  %3928 = vmatpush3.bf16.msra.mxu0 %v2052_v30 }
 0x463   : > { %3929 = vmatprep.subr.bf16.mxu0 %v2051_v33  ;;  %v2055_v45 = vpack.c.bf16 %v3904_v24, %v3903_v31 }
 0x464   : > { %v1958_v35 = vpop.f32.mrf.mxu0 }
 0x465   : > { %v2054_v49 = vpack.c.bf16 %v1958_v35, %v1955_v32 }
 0x466   : > { %v3907_v37 = vpop.f32.mrf.mxu0  ;;  %3930 = vmatpush3.bf16.msra.mxu0 %v2051_v33 }
 0x467   : > { %3931 = vmatprep.subr.bf16.mxu0 %v2050_v36 }
 0x468   : > { %v1971_v38 = vpop.f32.mrf.mxu0 }
 0x46a   : > { %v3908_v39 = vpop.f32.mrf.mxu0  ;;  %3932 = vmatpush3.bf16.msra.mxu0 %v2050_v36 }
 0x46b   : > { %v2057_v40 = vpack.c.bf16 %v3908_v39, %v3907_v37 }
 0x46c   : > { %v1974_v41 = vpop.f32.mrf.mxu0 }
 0x46d   : > { %v2056_v42 = vpack.c.bf16 %v1974_v41, %v1971_v38  ;;  %3934 = vmatmul.mubr.msk.bf16.vlgmr.msra.gmra.mxu0 %vm756_vm0, %v4403_v48  ;;  %3941 = vmatprep.subr.bf16.mxu1 %v2057_v40 }
 0x46e   : > { %v3911_v43 = vpop.f32.mrf.mxu0  ;;  %3942 = vmatpush3.bf16.msra.mxu1 %v2057_v40  ;;  %3937 = vmatprep.mubr.msk.bf16.mxu0 %vm756_vm0, %v4406_v50 }
 0x46f   : > { %3943 = vmatprep.subr.bf16.mxu1 %v2056_v42 }
 0x470   : > { %v1987_v44 = vpop.f32.mrf.mxu0 }
 0x472   : > { %v3912_v46 = vpop.f32.mrf.mxu0  ;;  %3944 = vmatpush3.bf16.msra.mxu1 %v2056_v42 }
 0x473   : > { %3945 = vmatprep.subr.bf16.mxu1 %v2055_v45  ;;  %v2059_v55 = vpack.c.bf16 %v3912_v46, %v3911_v43 }
 0x474   : > { %v1990_v47 = vpop.f32.mrf.mxu0 }
 0x475   : > { %3938 = vmatmul.mubr.msk.bf16.gmra.mxu0 %vm756_vm0, %v4413_v57  ;;  %v2058_v59 = vpack.c.bf16 %v1990_v47, %v1987_v44 }
 0x476   : > { %v3915_v51 = vpop.f32.mrf.mxu0  ;;  %3946 = vmatpush3.bf16.msra.mxu1 %v2055_v45  ;;  %v4136_v45 = vld [vmem:[%s4654_s13] sm:$0xff]  }
 0x477   : > { %3947 = vmatprep.subr.bf16.mxu1 %v2054_v49 }
 0x478   : > { %v2003_v48 = vpop.f32.mrf.mxu0 }
 0x47a   : > { %v3916_v52 = vpop.f32.mrf.mxu0  ;;  %3948 = vmatpush3.bf16.msra.mxu1 %v2054_v49 }
 0x47b   : > { %v2061_v34 = vpack.c.bf16 %v3916_v52, %v3915_v51 }
 0x47c   : > { %v2006_v53 = vpop.f32.mrf.mxu0 }
 0x47d   : > { %v2060_v50 = vpack.c.bf16 %v2006_v53, %v2003_v48  ;;  %3950 = vmatmul.mubr.msk.bf16.vlgmr.msra.gmra.mxu1 %vm756_vm0, %v4423_v0  ;;  %3957 = vmatprep.subr.bf16.mxu1 %v2061_v34 }
 0x47e   : > { %v3919_v54 = vpop.f32.mrf.mxu0  ;;  %3958 = vmatpush3.bf16.msra.mxu1 %v2061_v34  ;;  %3953 = vmatprep.mubr.msk.bf16.mxu1 %vm756_vm0, %v4426_v2 }
 0x47f   : > { %3959 = vmatprep.subr.bf16.mxu1 %v2060_v50 }
 0x480   : > { %v2019_v57 = vpop.f32.mrf.mxu0 }
 0x482   : > { %v3920_v56 = vpop.f32.mrf.mxu0  ;;  %3960 = vmatpush3.bf16.msra.mxu1 %v2060_v50 }
 0x483   : > { %3961 = vmatprep.subr.bf16.mxu1 %v2059_v55 }
 0x484   : > { %v2022_v58 = vpop.f32.mrf.mxu0 }
 0x485   : > { %3954 = vmatmul.mubr.msk.bf16.gmra.mxu1 %vm756_vm0, %v4433_v9  ;;  %v2063_v9 = vpack.c.bf16 %v3920_v56, %v3919_v54 }
 0x486   : > { %v3923_v61 = vpop.f32.mrf.mxu0  ;;  %3962 = vmatpush3.bf16.msra.mxu1 %v2059_v55  ;;  %3965 = vmatprep.mubr.msk.bf16.mxu1 %vm756_vm0, %v4436_v11  ;;  %v2062_v11 = vpack.c.bf16 %v2022_v58, %v2019_v57 }
 0x487   : > { %3963 = vmatprep.subr.bf16.mxu1 %v2058_v59 }
 0x488   : > { %v2035_v0 = vpop.f32.mrf.mxu0 }
 0x48a   : > { %v3924_v62 = vpop.f32.mrf.mxu0  ;;  %3964 = vmatpush3.bf16.msra.mxu1 %v2058_v59 }
 0x48b   : > { %v2065_v2 = vpack.c.bf16 %v3924_v62, %v3923_v61 }
 0x48c   : > { %v2038_v63 = vpop.f32.mrf.mxu0 }
 0x48d   : > { %3966 = vmatmul.mubr.msk.bf16.vlgmr.msra.gmra.mxu1 %vm756_vm0, %v4443_v16  ;;  %3973 = vmatprep.subr.bf16.mxu1 %v2065_v2  ;;  %v2064_v1 = vpack.c.bf16 %v2038_v63, %v2035_v0  ;;  %v4235_v16 = vmov 0.0  }
 0x48e   : > { %3974 = vmatpush3.bf16.msra.mxu1 %v2065_v2  ;;  %3969 = vmatprep.mubr.msk.bf16.mxu1 %vm756_vm0, %v4446_v18 }
 0x48f   : > { %3975 = vmatprep.subr.bf16.mxu1 %v2064_v1  ;;  %4001 = vmatprep.subr.bf16.mxu0 %v4235_v16 }
 0x490   : > { %4009 = vmatprep.mubr.msk.bf16.mxu0 %vm4236_vm1, %v4235_v16 }
 0x492   : > { %3976 = vmatpush3.bf16.msra.mxu1 %v2064_v1 }
 0x493   : > { %3977 = vmatprep.subr.bf16.mxu1 %v2063_v9 }
 0x495   : > { %3970 = vmatmul.mubr.msk.bf16.gmra.mxu1 %vm756_vm0, %v4453_v23 }
 0x496   : > { %3978 = vmatpush3.bf16.msra.mxu1 %v2063_v9  ;;  %3981 = vmatprep.mubr.msk.bf16.mxu1 %vm756_vm0, %v4456_v25 }
 0x497   : > { %3979 = vmatprep.subr.bf16.mxu1 %v2062_v11 }
 0x49a   : > { %3980 = vmatpush3.bf16.msra.mxu1 %v2062_v11 }
 0x49b   : > { %3989 = vmatprep.subr.bf16.mxu1 %v4235_v16 }
 0x49d   : > { %3982 = vmatmul.mubr.msk.bf16.vlgmr.msra.gmra.mxu1 %vm756_vm0, %v4463_v27  ;;  %v4663_v27 = vld [vmem:[%s4992_s6 + $0x2] ss:$0 sm:$0xff] }
 0x49e   : > { %3985 = vmatprep.mubr.msk.bf16.mxu1 %vm756_vm0, %v4466_v28 }
 0x4a5   : > { %3986 = vmatmul.mubr.msk.bf16.gmra.mxu1 %vm756_vm0, %v4473_v29 }
 0x4a6   : > { %3997 = vmatprep.mubr.msk.bf16.mxu1 %vm4236_vm1, %v4235_v16 }
 0x52d   : > { %v3935_v18 = vpop.f32.mrf.mxu0 }
 0x52e   : > { %v2333_v10 = vadd.f32 %v3935_v18, %v4663_v27 }
 0x52f   : > { %v2100_v23 = vpop.f32.mrf.mxu0 }
 0x530   : > { %v2365_v22 = vmax.f32 %v2333_v10, 0.0  ;;  %v2331_v60 = vadd.f32 %v4663_v27, %v2100_v23 }
 0x531   : > { %v3936_v25 = vpop.f32.mrf.mxu0 }
 0x532   : > { %v2334_v13 = vadd.f32 %v3936_v25, %v4663_v27  ;;  %v2363_v35 = vmax.f32 %v2331_v60, 0.0 }
 0x533   : > { %v2103_v28 = vpop.f32.mrf.mxu0 }
 0x534   : > { %v2366_v30 = vmax.f32 %v2334_v13, 0.0  ;;  %v2332_v31 = vadd.f32 %v4663_v27, %v2103_v28 }
 0x535   : > { %v3939_v29 = vpop.f32.mrf.mxu0 }
 0x536   : > { %v2337_v3 = vadd.f32 %v3939_v29, %v4663_v27  ;;  %v2396_v36 = vpack.c.bf16 %v2366_v30, %v2365_v22  ;;  %v2364_v37 = vmax.f32 %v2332_v31, 0.0 }
 0x537   : > { %v2116_v4 = vpop.f32.mrf.mxu0 }
 0x538   : > { %v2335_v5 = vadd.f32 %v4663_v27, %v2116_v4  ;;  %v2369_v7 = vmax.f32 %v2337_v3, 0.0  ;;  %v2395_v40 = vpack.c.bf16 %v2364_v37, %v2363_v35  ;;  %v4137_v3 = vld [vmem:[%s4654_s13 + $0x8] sm:$0xff]  }
 0x539   : > { %v3940_v6 = vpop.f32.mrf.mxu0 }
 0x53a   : > { %v2338_v8 = vadd.f32 %v3940_v6, %v4663_v27  ;;  %v2367_v14 = vmax.f32 %v2335_v5, 0.0 }
 0x53b   : > { %v2119_v12 = vpop.f32.mrf.mxu0 }
 0x53c   : > { %v2370_v15 = vmax.f32 %v2338_v8, 0.0  ;;  %v2336_v17 = vadd.f32 %v4663_v27, %v2119_v12 }
 0x53d   : > { %v3951_v19 = vpop.f32.mrf.mxu1 }
 0x53e   : > { %v2398_v20 = vpack.c.bf16 %v2370_v15, %v2369_v7  ;;  %v2368_v21 = vmax.f32 %v2336_v17, 0.0  ;;  %v2341_v54 = vadd.f32 %v3951_v19, %v4663_v27 }
 0x53f   : > { %v2165_v26 = vpop.f32.mrf.mxu1 }
 0x540   : > { %v2397_v32 = vpack.c.bf16 %v2368_v21, %v2367_v14  ;;  %3990 = vmatpush3.bf16.msra.mxu1 %v2398_v20  ;;  %v2373_v0 = vmax.f32 %v2341_v54, 0.0  ;;  %v2339_v62 = vadd.f32 %v4663_v27, %v2165_v26 }
 0x541   : > { %v3952_v33 = vpop.f32.mrf.mxu1  ;;  %3991 = vmatprep.subr.bf16.mxu1 %v4235_v16 }
 0x542   : > { %v2342_v52 = vadd.f32 %v3952_v33, %v4663_v27  ;;  %v2371_v11 = vmax.f32 %v2339_v62, 0.0  ;;  %v4144_v62 = vld [vmem:[%s4991_s5 + $0x68] sm:$0xff]  }
 0x543   : > { %v2168_v24 = vpop.f32.mrf.mxu1 }
 0x544   : > { %3992 = vmatpush3.bf16.msra.mxu1 %v2397_v32  ;;  %v2374_v56 = vmax.f32 %v2342_v52, 0.0  ;;  %v2340_v58 = vadd.f32 %v4663_v27, %v2168_v24 }
 0x545   : > { %v3955_v38 = vpop.f32.mrf.mxu1  ;;  %3993 = vmatprep.subr.bf16.mxu1 %v4235_v16 }
 0x546   : > { %v2345_v41 = vadd.f32 %v3955_v38, %v4663_v27  ;;  %v2400_v63 = vpack.c.bf16 %v2374_v56, %v2373_v0  ;;  %v2372_v1 = vmax.f32 %v2340_v58, 0.0  ;;  %v4142_v0 = vld [vmem:[%s4991_s5 + $0x70] sm:$0xff]  }
 0x547   : > { %v2181_v39 = vpop.f32.mrf.mxu1 }
 0x548   : > { %3994 = vmatpush3.bf16.msra.mxu1 %v2396_v36  ;;  %v2377_v46 = vmax.f32 %v2345_v41, 0.0  ;;  %v2343_v47 = vadd.f32 %v4663_v27, %v2181_v39  ;;  %v2399_v25 = vpack.c.bf16 %v2372_v1, %v2371_v11  ;;  %v4138_v41 = vld [vmem:[%s4654_s13 + $0x10] sm:$0xff]   ;;  %v4147_v1 = vld [vmem:[%s4991_s5 + $0x20] sm:$0xff]   ;;  %v4149_v11 = vld [vmem:[%s4991_s5 + $0x18] sm:$0xff]  }
 0x549   : > { %v3956_v42 = vpop.f32.mrf.mxu1  ;;  %3995 = vmatprep.subr.bf16.mxu1 %v4235_v16 }
 0x54a   : > { %v2346_v43 = vadd.f32 %v3956_v42, %v4663_v27  ;;  %v2375_v57 = vmax.f32 %v2343_v47, 0.0 }
 0x54b   : > { %v2184_v44 = vpop.f32.mrf.mxu1 }
 0x54c   : > { %v2378_v49 = vmax.f32 %v2346_v43, 0.0  ;;  %v2344_v51 = vadd.f32 %v4663_v27, %v2184_v44  ;;  %3996 = vmatpush3.bf16.msra.mxu1 %v2395_v40 }
 0x54d   : > { %v3967_v48 = vpop.f32.mrf.mxu1  ;;  %4013 = vmatprep.subr.bf16.mxu1 %v4235_v16 }
 0x54e   : > { %v2402_v34 = vpack.c.bf16 %v2378_v49, %v2377_v46  ;;  %v2376_v53 = vmax.f32 %v2344_v51, 0.0  ;;  %v2349_v15 = vadd.f32 %v3967_v48, %v4663_v27 }
 0x54f   : > { %v2230_v50 = vpop.f32.mrf.mxu1  ;;  %3998 = vmatmul.mubr.msk.bf16.vlgmr.msra.gmra.mxu1 %vm756_vm0, %v4136_v45 }
 0x550   : > { %4002 = vmatpush3.bf16.msra.mxu0 %v2402_v34  ;;  %4021 = vmatprep.mubr.msk.bf16.mxu1 %vm4236_vm1, %v4235_v16  ;;  %v2401_v59 = vpack.c.bf16 %v2376_v53, %v2375_v57  ;;  %v2381_v60 = vmax.f32 %v2349_v15, 0.0  ;;  %v2347_v30 = vadd.f32 %v4663_v27, %v2230_v50 }
 0x551   : > { %v3968_v55 = vpop.f32.mrf.mxu1  ;;  %4003 = vmatprep.subr.bf16.mxu0 %v4235_v16 }
 0x552   : > { %v2350_v10 = vadd.f32 %v3968_v55, %v4663_v27  ;;  %v2379_v35 = vmax.f32 %v2347_v30, 0.0 }
 0x553   : > { %v2233_v61 = vpop.f32.mrf.mxu1 }
 0x554   : > { %4004 = vmatpush3.bf16.msra.mxu0 %v2401_v59  ;;  %v2382_v20 = vmax.f32 %v2350_v10, 0.0  ;;  %v2348_v21 = vadd.f32 %v4663_v27, %v2233_v61  ;;  %v4139_v59 = vld [vmem:[%s4654_s13 + $0x18] sm:$0xff]  }
 0x555   : > { %v3971_v2 = vpop.f32.mrf.mxu1  ;;  %4005 = vmatprep.subr.bf16.mxu0 %v4235_v16  ;;  %v4140_v61 = vld [vmem:[%s4991_s5 + $0x78] sm:$0xff]  }
 0x556   : > { %v2353_v18 = vadd.f32 %v3971_v2, %v4663_v27  ;;  %v2404_v32 = vpack.c.bf16 %v2382_v20, %v2381_v60  ;;  %v2380_v33 = vmax.f32 %v2348_v21, 0.0  ;;  %v4145_v2 = vld [vmem:[%s4991_s5 + $0x28] sm:$0xff]  }
 0x557   : > { %v2246_v9 = vpop.f32.mrf.mxu1 }
 0x558   : > { %4006 = vmatpush3.bf16.msra.mxu0 %v2400_v63  ;;  %v2385_v4 = vmax.f32 %v2353_v18, 0.0  ;;  %v2351_v5 = vadd.f32 %v4663_v27, %v2246_v9  ;;  %v2403_v38 = vpack.c.bf16 %v2380_v33, %v2379_v35  ;;  %v4146_v63 = vld [vmem:[%s4991_s5 + $0x60] sm:$0xff]   ;;  %v4148_v9 = vld [vmem:[%s4991_s5 + $0x58] sm:$0xff]   ;;  %v4150_v18 = vld [vmem:[%s4991_s5 + $0x50] sm:$0xff]  }
 0x559   : > { %v3972_v23 = vpop.f32.mrf.mxu1  ;;  %4007 = vmatprep.subr.bf16.mxu0 %v4235_v16 }
 0x55a   : > { %v2354_v28 = vadd.f32 %v3972_v23, %v4663_v27  ;;  %v2383_v17 = vmax.f32 %v2351_v5, 0.0  ;;  %v4151_v23 = vld [vmem:[%s4991_s5 + $0x10] sm:$0xff]   ;;  %v2619_v5 = vld [vmem:[%s4775_s9 + $0x8] sm:$0xff] }
 0x55b   : > { %v2249_v29 = vpop.f32.mrf.mxu1 }
 0x55c   : > { %v2386_v6 = vmax.f32 %v2354_v28, 0.0  ;;  %v2352_v7 = vadd.f32 %v4663_v27, %v2249_v29  ;;  %4008 = vmatpush3.bf16.msra.mxu0 %v2399_v25  ;;  %v4152_v25 = vld [vmem:[%s4991_s5 + $0x48] sm:$0xff]   ;;  %v4154_v29 = vld [vmem:[%s4991_s5 + $0x40] sm:$0xff]  }
 0x55d   : > { %v3983_v8 = vpop.f32.mrf.mxu1  ;;  %4025 = vmatprep.subr.bf16.mxu0 %v4235_v16  ;;  %v4153_v28 = vld [vmem:[%s4991_s5 + $0x8] sm:$0xff]  }
 0x55e   : > { %v2406_v12 = vpack.c.bf16 %v2386_v6, %v2385_v4  ;;  %v2384_v13 = vmax.f32 %v2352_v7, 0.0  ;;  %v2357_v51 = vadd.f32 %v3983_v8, %v4663_v27  ;;  %v2618_v4 = vld [vmem:[%s4775_s9] sm:$0xff] }
 0x55f   : > { %v2295_v14 = vpop.f32.mrf.mxu1  ;;  %4010 = vmatmul.mubr.msk.bf16.vlgmr.msra.gmra.mxu0 %vm756_vm0, %v4137_v3  ;;  %v4155_v3 = vld [vmem:[%s4991_s5] sm:$0xff]   ;;  %v2628_v6 = vadd.f32 %v2619_v5, %v2618_v4 }
 0x560   : > { %4014 = vmatpush3.bf16.msra.mxu1 %v2406_v12  ;;  %4033 = vmatprep.mubr.msk.bf16.mxu0 %vm4236_vm1, %v4235_v16  ;;  %v2405_v22 = vpack.c.bf16 %v2384_v13, %v2383_v17  ;;  %v2389_v50 = vmax.f32 %v2357_v51, 0.0  ;;  %v2355_v54 = vadd.f32 %v4663_v27, %v2295_v14  ;;  %v2620_v12 = vld [vmem:[%s4775_s9 + $0x10] sm:$0xff]  ;;  %v2621_v13 = vld [vmem:[%s4775_s9 + $0x18] sm:$0xff] }
 0x561   : > { %v3984_v19 = vpop.f32.mrf.mxu1  ;;  %4015 = vmatprep.subr.bf16.mxu1 %v4235_v16  ;;  %v2629_v7 = vrot.slane %v2628_v6, 4  ;;  %v2635_v15 = vadd.f32 %v2621_v13, %v2620_v12 }
 0x562   : > { %v2358_v46 = vadd.f32 %v3984_v19, %v4663_v27  ;;  %v2387_v56 = vmax.f32 %v2355_v54, 0.0 }
 0x563   : > { %v2298_v26 = vpop.f32.mrf.mxu1  ;;  %v2630_v8 = vadd.f32 %v2629_v7, %v2628_v6  ;;  %v2636_v19 = vrot.slane %v2635_v15, 4 }
 0x564   : > { %4016 = vmatpush3.bf16.msra.mxu1 %v2405_v22  ;;  %v2390_v52 = vmax.f32 %v2358_v46, 0.0  ;;  %v2356_v34 = vadd.f32 %v4663_v27, %v2298_v26  ;;  %v2622_v22 = vld [vmem:[%s4775_s9 + $0x20] sm:$0xff]  ;;  %v2623_v26 = vld [vmem:[%s4775_s9 + $0x28] sm:$0xff] }
 0x565   : > { %v3987_v31 = vpop.f32.mrf.mxu1  ;;  %4017 = vmatprep.subr.bf16.mxu1 %v4235_v16  ;;  %v2631_v10 = vrot.slane %v2630_v8, 2  ;;  %v2637_v21 = vadd.f32 %v2636_v19, %v2635_v15 }
 0x566   : > { %v2361_v36 = vadd.f32 %v3987_v31, %v4663_v27  ;;  %v2408_v57 = vpack.c.bf16 %v2390_v52, %v2389_v50  ;;  %v2388_v55 = vmax.f32 %v2356_v34, 0.0  ;;  %v2642_v31 = vadd.f32 %v2623_v26, %v2622_v22 }
 0x567   : > { %v2311_v24 = vpop.f32.mrf.mxu1  ;;  %v2632_v14 = vadd.f32 %v2631_v10, %v2630_v8  ;;  %v2638_v30 = vrot.slane %v2637_v21, 2 }
 0x568   : > { %4018 = vmatpush3.bf16.msra.mxu1 %v2404_v32  ;;  %v2393_v42 = vmax.f32 %v2361_v36, 0.0  ;;  %v2359_v43 = vadd.f32 %v4663_v27, %v2311_v24  ;;  %v2407_v58 = vpack.c.bf16 %v2388_v55, %v2387_v56  ;;  %v2643_v35 = vrot.slane %v2642_v31, 4 }
 0x569   : > { %v3988_v37 = vpop.f32.mrf.mxu1  ;;  %4019 = vmatprep.subr.bf16.mxu1 %v4235_v16  ;;  %v2633_v17 = vrot.slane %v2632_v14, 1  ;;  %v2639_v24 = vadd.f32 %v2638_v30, %v2637_v21 }
 0x56a   : > { %v2362_v39 = vadd.f32 %v3988_v37, %v4663_v27  ;;  %v2391_v48 = vmax.f32 %v2359_v43, 0.0 }
 0x56b   : > { %v2314_v40 = vpop.f32.mrf.mxu1  ;;  %v2634_v20 = vadd.f32 %v2633_v17, %v2632_v14 }
 0x56c   : > { %v2394_v44 = vmax.f32 %v2362_v39, 0.0  ;;  %4020 = vmatpush3.bf16.msra.mxu1 %v2403_v38  ;;  %v2360_v45 = vadd.f32 %v4663_v27, %v2314_v40  ;;  %v4141_v27 = vld [vmem:[%s4991_s5 + $0x38] sm:$0xff]   ;;  %v2640_v38 = vrot.slane %v2639_v24, 1  ;;  %v2644_v39 = vadd.f32 %v2643_v35, %v2642_v31 }
 0x56d   : > { %3613 = vmatprep.subr.bf16.mxu1 %v4140_v61  ;;  %v2657_v60 = vmul.f32 0.0625, %v2634_v20 }
 0x56e   : > { %v2410_v47 = vpack.c.bf16 %v2394_v44, %v2393_v42  ;;  %v2392_v49 = vmax.f32 %v2360_v45, 0.0  ;;  %v2645_v43 = vrot.slane %v2644_v39, 2 }
 0x56f   : > { %4022 = vmatmul.mubr.msk.bf16.vlgmr.msra.gmra.mxu1 %vm756_vm0, %v4138_v41  ;;  %v4783_v32 = vsub.f32 %v2618_v4, %v2657_v60  ;;  %v4785_v33 = vsub.f32 %v2619_v5, %v2657_v60  ;;  %v2641_v41 = vadd.f32 %v2640_v38, %v2639_v24 }
 0x570   : > { %4026 = vmatpush3.bf16.msra.mxu0 %v2410_v47  ;;  %v2409_v53 = vpack.c.bf16 %v2392_v49, %v2391_v48  ;;  %3614 = vmatpush3.bf16.msra.mxu1 %v4141_v27  ;;  %v4792_v47 = vld [vmem:[%s4775_s9 + $0x30] sm:$0xff]  ;;  %v4795_v49 = vld [vmem:[%s4775_s9 + $0x38] sm:$0xff]  ;;  %v2646_v48 = vadd.f32 %v2645_v43, %v2644_v39  ;;  %s3424_s9 = sshll.u32 %s4301_s28, 10  ;;  %s4173_s28 = scalar_lea.vmem %s4941_s15, 1024 }
 0x571   : > { %4027 = vmatprep.subr.bf16.mxu0 %v4235_v16  ;;  %3615 = vmatprep.subr.bf16.mxu1 %v4142_v0  ;;  %v2669_v36 = vmul.f32 %v4783_v32, %v4783_v32  ;;  %v2670_v37 = vmul.f32 %v4785_v33, %v4785_v33  ;;  %v2658_v46 = vmul.f32 0.0625, %v2641_v41  ;;  %s4939_s16 = scalar_lea.hbm %s4993_s7, %s3424_s9  ;;  %p4174_p11 = scmp.ne.s32.totalorder %s4941_s15, %s4173_s28 }
 0x572   : > { %v2647_v56 = vrot.slane %v2646_v48, 1  ;;  %p4181_p1 = scmp.lt.s32.totalorder %s4179_s19, %s4173_s28 }
 0x573   : > { %v2677_v40 = vadd.f32 %v2670_v37, %v2669_v36  ;;  %v4797_v50 = vsub.f32 %v2620_v12, %v2658_v46  ;;  %v4799_v54 = vsub.f32 %v2621_v13, %v2658_v46  ;;  %p4175_p12 = pnand %p4174_p11, %p4318_p5 }
 0x574   : > { %4028 = vmatpush3.bf16.msra.mxu0 %v2409_v53  ;;  %p4182_p2 = por %p4181_p1, %p4180_p0 }
 0x575   : > { %4029 = vmatprep.subr.bf16.mxu0 %v4235_v16  ;;  %v2678_v45 = vrot.slane %v2677_v40, 4  ;;  %v2671_v61 = vmul.f32 %v4797_v50, %v4797_v50  ;;  %v2672_v27 = vmul.f32 %v4799_v54, %v4799_v54  ;;  %p4176_p13 = pneg %p4175_p12 }
 0x577   : > { %v2679_v53 = vadd.f32 %v2678_v45, %v2677_v40  ;;  %p4183_p3 = pnand %p4182_p2, %p4176_p13 }
 0x578   : > { %4030 = vmatpush3.bf16.msra.mxu0 %v2408_v57  ;;  %v2649_v57 = vadd.f32 %v4795_v49, %v4792_v47 }
 0x579   : > { %4031 = vmatprep.subr.bf16.mxu0 %v4235_v16  ;;  %v4143_v16 = vld [vmem:[%s4991_s5 + $0x30] sm:$0xff]  }
 0x57a   : > { %3616 = vmatpush3.bf16.msra.mxu1 %v4143_v16  ;;  %v2650_v0 = vrot.slane %v2649_v57, 4 }
 0x57b   : > { %3617 = vmatprep.subr.bf16.mxu1 %v4144_v62  ;;  %v2648_v62 = vadd.f32 %v2647_v56, %v2646_v48 }
 0x57c   : > { %4032 = vmatpush3.bf16.msra.mxu0 %v2407_v58 }
 0x57e   : > { %3618 = vmatpush3.bf16.msra.mxu1 %v4145_v2 }
 0x57f   : > { %4034 = vmatmul.mubr.msk.bf16.vlgmr.msra.gmra.mxu0 %vm756_vm0, %v4139_v59  ;;  %3619 = vmatprep.subr.bf16.mxu1 %v4146_v63  ;;  %v2680_v59 = vrot.slane %v2679_v53, 2 }
 0x581   : > { %v2681_v63 = vadd.f32 %v2680_v59, %v2679_v53 }
 0x582   : > { %3620 = vmatpush3.bf16.msra.mxu1 %v4147_v1  ;;  %v2684_v1 = vadd.f32 %v2672_v27, %v2671_v61 }
 0x583   : > { %3621 = vmatprep.subr.bf16.mxu1 %v4148_v9  ;;  %v2651_v9 = vadd.f32 %v2650_v0, %v2649_v57 }
 0x585   : > { %v2652_v4 = vrot.slane %v2651_v9, 2 }
 0x586   : > { %3622 = vmatpush3.bf16.msra.mxu1 %v4149_v11 }
 0x587   : > { %3623 = vmatprep.subr.bf16.mxu1 %v4150_v18  ;;  %v2653_v19 = vadd.f32 %v2652_v4, %v2651_v9 }
 0x589   : > { %v2654_v36 = vrot.slane %v2653_v19, 1 }
 0x58a   : > { %3624 = vmatpush3.bf16.msra.mxu1 %v4151_v23  ;;  %v2659_v23 = vmul.f32 0.0625, %v2648_v62 }
 0x58b   : > { %3625 = vmatprep.subr.bf16.mxu1 %v4152_v25 }
 0x58c   : > { %v4807_v7 = vsub.f32 %v2622_v22, %v2659_v23  ;;  %v4809_v8 = vsub.f32 %v2623_v26, %v2659_v23 }
 0x58e   : > { %3626 = vmatpush3.bf16.msra.mxu1 %v4153_v28  ;;  %v2673_v22 = vmul.f32 %v4807_v7, %v4807_v7  ;;  %v2674_v26 = vmul.f32 %v4809_v8, %v4809_v8 }
 0x58f   : > { %3627 = vmatprep.subr.bf16.mxu1 %v4154_v29  ;;  %v2682_v29 = vrot.slane %v2681_v63, 1 }
 0x590   : > { %v2691_v39 = vadd.f32 %v2674_v26, %v2673_v22 }
 0x591   : > { %v2683_v15 = vadd.f32 %v2682_v29, %v2681_v63 }
 0x592   : > { %3628 = vmatpush3.bf16.msra.mxu1 %v4155_v3  ;;  %v2685_v3 = vrot.slane %v2684_v1, 4  ;;  %v2692_v48 = vrot.slane %v2691_v39, 4 }
 0x593   : > { %v2705_v24 = vmul.f32 0.0625, %v2683_v15 }
 0x594   : > { %v2686_v17 = vadd.f32 %v2685_v3, %v2684_v1  ;;  %v2693_v61 = vadd.f32 %v2692_v48, %v2691_v39 }
 0x596   : > { %v2687_v35 = vrot.slane %v2686_v17, 2 }
 0x598   : > { %v2688_v43 = vadd.f32 %v2687_v35, %v2686_v17 }
 0x59a   : > { %v2689_v57 = vrot.slane %v2688_v43, 1 }
 0x59c   : > { %v2690_v63 = vadd.f32 %v2689_v57, %v2688_v43 }
 0x60f   : > { %v2455_v42 = vpop.f32.mrf.mxu1 }
 0x611   : > { %v3999_v44 = vpop.f32.mrf.mxu1 }
 0x612   : > { %v2655_v44 = vadd.f32 %v2654_v36, %v2653_v19 }
 0x613   : > { %v2458_v51 = vpop.f32.mrf.mxu1 }
 0x614   : > { %v2751_v52 = vadd.f32 %v2458_v51, %v2455_v42 }
 0x615   : > { %v4000_v34 = vpop.f32.mrf.mxu1 }
 0x616   : > { %v2752_v55 = vrot.slane %v2751_v52, 4 }
 0x618   : > { %v2753_v58 = vadd.f32 %v2752_v55, %v2751_v52  ;;  %v2660_v55 = vmul.f32 0.0625, %v2655_v44 }
 0x61a   : > { %v2754_v16 = vrot.slane %v2753_v58, 2  ;;  %v4828_v1 = vsub.f32 %v4792_v47, %v2660_v55  ;;  %v4831_v9 = vsub.f32 %v4795_v49, %v2660_v55 }
 0x61c   : > { %v2755_v2 = vadd.f32 %v2754_v16, %v2753_v58  ;;  %v2675_v47 = vmul.f32 %v4828_v1, %v4828_v1  ;;  %v2676_v49 = vmul.f32 %v4831_v9, %v4831_v9 }
 0x61e   : > { %v2756_v11 = vrot.slane %v2755_v2, 1 }
 0x61f   : > { %v2507_v18 = vpop.f32.mrf.mxu0 }
 0x620   : > { %v2757_v25 = vadd.f32 %v2756_v11, %v2755_v2 }
 0x621   : > { %v4011_v28 = vpop.f32.mrf.mxu0 }
 0x622   : > { %v2779_v5 = vmul.f32 0.0625, %v2757_v25  ;;  %v2694_v28 = vrot.slane %v2693_v61, 2 }
 0x623   : > { %v2510_v6 = vpop.f32.mrf.mxu0 }
 0x624   : > { %v4811_v10 = vsub.f32 %v2455_v42, %v2779_v5  ;;  %v4813_v12 = vsub.f32 %v2458_v51, %v2779_v5  ;;  %v2758_v13 = vadd.f32 %v2510_v6, %v2507_v18  ;;  %v2709_v42 = vadd.f32 1e-05, %v2705_v24 }
 0x625   : > { %v4012_v14 = vpop.f32.mrf.mxu0  ;;  %v2706_v5 = vmul.f32 0.0625, %v2690_v63 }
 0x626   : > { %v2791_v20 = vmul.f32 %v4811_v10, %v4811_v10  ;;  %v2792_v21 = vmul.f32 %v4813_v12, %v4813_v12  ;;  %v2759_v60 = vrot.slane %v2758_v13, 4  ;;  %4156 = vrsqrt.f32 %v2709_v42 }
 0x627   : > { %v2695_v14 = vadd.f32 %v2694_v28, %v2693_v61  ;;  %v2710_v19 = vadd.f32 1e-05, %v2706_v5 }
 0x628   : > { %v2799_v30 = vadd.f32 %v2792_v21, %v2791_v20  ;;  %v2760_v31 = vadd.f32 %v2759_v60, %v2758_v13  ;;  %v2698_v20 = vadd.f32 %v2676_v49, %v2675_v47 }
 0x62a   : > { %v2800_v37 = vrot.slane %v2799_v30, 4  ;;  %v2761_v38 = vrot.slane %v2760_v31, 2 }
 0x62c   : > { %v2801_v40 = vadd.f32 %v2800_v37, %v2799_v30  ;;  %v2762_v41 = vadd.f32 %v2761_v38, %v2760_v31  ;;  %v2696_v30 = vrot.slane %v2695_v14, 1  ;;  %v2699_v38 = vrot.slane %v2698_v20, 4 }
 0x62e   : > { %v2802_v45 = vrot.slane %v2801_v40, 2  ;;  %v2763_v46 = vrot.slane %v2762_v41, 1  ;;  %v2697_v43 = vadd.f32 %v2696_v30, %v2695_v14 }
 0x62f   : > { %v2559_v51 = vpop.f32.mrf.mxu1 }
 0x630   : > { %v2803_v52 = vadd.f32 %v2802_v45, %v2801_v40  ;;  %v2764_v34 = vadd.f32 %v2763_v46, %v2762_v41  ;;  %v4848_v41 = vld [vmem:[%s4992_s6 + $0x3] ss:$0 sm:$0xff]  ;;  %v2707_v61 = vmul.f32 0.0625, %v2697_v43 }
 0x631   : > { %v4023_v53 = vpop.f32.mrf.mxu1 }
 0x632   : > { %v2804_v56 = vrot.slane %v2803_v52, 1  ;;  %v2780_v58 = vmul.f32 0.0625, %v2764_v34  ;;  %v2700_v34 = vadd.f32 %v2699_v38, %v2698_v20 }
 0x633   : > { %v2562_v59 = vpop.f32.mrf.mxu1  ;;  %v4157_v21 = vpop.eup %4156 }
 0x634   : > { %v2805_v27 = vadd.f32 %v2804_v56, %v2803_v52  ;;  %v4823_v0 = vsub.f32 %v2507_v18, %v2780_v58  ;;  %v4825_v16 = vsub.f32 %v2510_v6, %v2780_v58  ;;  %v2765_v62 = vadd.f32 %v2562_v59, %v2559_v51 }
 0x635   : > { %v4024_v2 = vpop.f32.mrf.mxu1  ;;  %v2717_v36 = vmul.f32 %v4157_v21, %v4783_v32  ;;  %v2718_v37 = vmul.f32 %v4157_v21, %v4785_v33  ;;  %v2701_v28 = vrot.slane %v2700_v34, 2 }
 0x636   : > { %v2827_v11 = vmul.f32 0.0625, %v2805_v27  ;;  %v2793_v23 = vmul.f32 %v4823_v0, %v4823_v0  ;;  %v2794_v25 = vmul.f32 %v4825_v16, %v4825_v16  ;;  %v2766_v18 = vrot.slane %v2765_v62, 4 }
 0x637   : > { %v2729_v33 = vmul.f32 %v4848_v41, %v2717_v36  ;;  %v2730_v52 = vmul.f32 %v4848_v41, %v2718_v37 }
 0x638   : > { %v2831_v29 = vadd.f32 1e-05, %v2827_v11  ;;  %v2806_v3 = vadd.f32 %v2794_v25, %v2793_v23  ;;  %v2767_v4 = vadd.f32 %v2766_v18, %v2765_v62  ;;  %v4876_v23 = vld [vmem:[%s4992_s6 + $0x6] ss:$0 sm:$0xff] }
 0x63a   : > { %4158 = vrsqrt.f32 %v2831_v29  ;;  %v2807_v6 = vrot.slane %v2806_v3, 4  ;;  %v2768_v13 = vrot.slane %v2767_v4, 2 }
 0x63b   : > { %4160 = vrsqrt.f32 %v2710_v19  ;;  %v2702_v19 = vadd.f32 %v2701_v28, %v2700_v34 }
 0x63c   : > { %v2808_v15 = vadd.f32 %v2807_v6, %v2806_v3  ;;  %v2769_v17 = vadd.f32 %v2768_v13, %v2767_v4  ;;  %v2711_v13 = vadd.f32 1e-05, %v2707_v61 }
 0x63e   : > { %v2809_v60 = vrot.slane %v2808_v15, 2  ;;  %v2770_v22 = vrot.slane %v2769_v17, 1 }
 0x63f   : > { %v4841_v26 = vpop.f32.mrf.mxu0 }
 0x640   : > { %v2810_v31 = vadd.f32 %v2809_v60, %v2808_v15  ;;  %v2771_v24 = vadd.f32 %v2770_v22, %v2769_v17 }
 0x641   : > { %v4035_v35 = vpop.f32.mrf.mxu0 }
 0x642   : > { %v2811_v39 = vrot.slane %v2810_v31, 1  ;;  %v2781_v40 = vmul.f32 0.0625, %v2771_v24  ;;  %v2703_v24 = vrot.slane %v2702_v19, 1 }
 0x643   : > { %v2614_v42 = vpop.f32.mrf.mxu0 }
 0x644   : > { %v2812_v44 = vadd.f32 %v2811_v39, %v2810_v31  ;;  %v4850_v45 = vsub.f32 %v2559_v51, %v2781_v40  ;;  %v4852_v46 = vsub.f32 %v2562_v59, %v2781_v40  ;;  %v2772_v32 = vadd.f32 %v2614_v42, %v4841_v26  ;;  %v4864_v51 = vld [vmem:[%s4992_s6 + $0x4] ss:$0 sm:$0xff]  ;;  %v4869_v59 = vld [vmem:[%s4992_s6 + $0x5] ss:$0 sm:$0xff] }
 0x645   : > { %v4036_v48 = vpop.f32.mrf.mxu0  ;;  %v2741_v25 = vadd.f32 %v4864_v51, %v2729_v33  ;;  %v2742_v18 = vadd.f32 %v4864_v51, %v2730_v52 }
 0x646   : > { %v2828_v53 = vmul.f32 0.0625, %v2812_v44  ;;  %v2795_v57 = vmul.f32 %v4850_v45, %v4850_v45  ;;  %v2796_v55 = vmul.f32 %v4852_v46, %v4852_v46  ;;  %v2773_v56 = vrot.slane %v2772_v32, 4 }
 0x647   : > { %v4159_v58 = vpop.eup %4158  ;;  %v2871_v6 = vpack.c.bf16 %v2742_v18, %v2741_v25  ;;  %v2704_v44 = vadd.f32 %v2703_v24, %v2702_v19 }
 0x648   : > { %v2839_v27 = vmul.f32 %v4159_v58, %v4811_v10  ;;  %v2840_v62 = vmul.f32 %v4159_v58, %v4813_v12  ;;  %v2832_v2 = vadd.f32 1e-05, %v2828_v53  ;;  %v2813_v63 = vadd.f32 %v2796_v55, %v2795_v57  ;;  %v4161_v14 = vpop.eup %4160 }
 0x649   : > { %v2774_v11 = vadd.f32 %v2773_v56, %v2772_v32  ;;  %v2719_v22 = vmul.f32 %v4161_v14, %v4797_v50  ;;  %v2720_v30 = vmul.f32 %v4161_v14, %v4799_v54  ;;  %v2708_v55 = vmul.f32 0.0625, %v2704_v44 }
 0x64a   : > { %v2852_v29 = vmul.f32 %v4869_v59, %v2840_v62  ;;  %4162 = vrsqrt.f32 %v2832_v2  ;;  %v2814_v3 = vrot.slane %v2813_v63, 4  ;;  %v2851_v10 = vmul.f32 %v4869_v59, %v2839_v27 }
 0x64b   : > { %v2775_v12 = vrot.slane %v2774_v11, 2  ;;  %4164 = vrsqrt.f32 %v2711_v13  ;;  %v2731_v39 = vmul.f32 %v4848_v41, %v2719_v22  ;;  %v2732_v40 = vmul.f32 %v4848_v41, %v2720_v30 }
 0x64c   : > { %v2815_v4 = vadd.f32 %v2814_v3, %v2813_v63  ;;  %v2863_v5 = vadd.f32 %v4876_v23, %v2851_v10  ;;  %v2864_v47 = vadd.f32 %v4876_v23, %v2852_v29  ;;  %v2712_v2 = vadd.f32 1e-05, %v2708_v55 }
 0x64d   : > { %v2776_v49 = vadd.f32 %v2775_v12, %v2774_v11  ;;  %v2743_v53 = vadd.f32 %v4864_v51, %v2731_v39 }
 0x64e   : > { %v2816_v15 = vrot.slane %v2815_v4, 2  ;;  %v2872_v17 = vpack.c.bf16 %v2864_v47, %v2863_v5 }
 0x64f   : > { %v2777_v20 = vrot.slane %v2776_v49, 1 }
 0x650   : > { %v2817_v21 = vadd.f32 %v2816_v15, %v2815_v4  ;;  %3044 = vmatprep.mubr.bf16.mxu1 %v2872_v17 }
 0x651   : > { %v2778_v60 = vadd.f32 %v2777_v20, %v2776_v49  ;;  %3045 = vmatmul.mubr.bf16.vlgmr.msra.gmra.mxu1 %v2871_v6 }
 0x652   : > { %v2818_v31 = vrot.slane %v2817_v21, 1 }
 0x653   : > { %v2782_v35 = vmul.f32 0.0625, %v2778_v60 }
 0x654   : > { %v2819_v36 = vadd.f32 %v2818_v31, %v2817_v21 }
 0x655   : > { %v2789_v37 = vsub.f32 %v4841_v26, %v2782_v35  ;;  %v2790_v38 = vsub.f32 %v2614_v42, %v2782_v35  ;;  %v2744_v26 = vadd.f32 %v4864_v51, %v2732_v40 }
 0x656   : > { %v2829_v43 = vmul.f32 0.0625, %v2819_v36 }
 0x657   : > { %v4163_v32 = vpop.eup %4162  ;;  %v2797_v48 = vmul.f32 %v2789_v37, %v2789_v37  ;;  %v2798_v33 = vmul.f32 %v2790_v38, %v2790_v38  ;;  %v2873_v27 = vpack.c.bf16 %v2744_v26, %v2743_v53 }
 0x658   : > { %v2841_v50 = vmul.f32 %v4163_v32, %v4823_v0  ;;  %v2842_v54 = vmul.f32 %v4163_v32, %v4825_v16  ;;  %v2833_v52 = vadd.f32 1e-05, %v2829_v43  ;;  %v4165_v16 = vpop.eup %4164 }
 0x659   : > { %v2820_v34 = vadd.f32 %v2798_v33, %v2797_v48  ;;  %v2721_v25 = vmul.f32 %v4165_v16, %v4807_v7  ;;  %v2722_v18 = vmul.f32 %v4165_v16, %v4809_v8 }
 0x65a   : > { %v2854_v42 = vmul.f32 %v4869_v59, %v2842_v54  ;;  %4166 = vrsqrt.f32 %v2833_v52  ;;  %v2853_v57 = vmul.f32 %v4869_v59, %v2841_v50 }
 0x65b   : > { %v2821_v56 = vrot.slane %v2820_v34, 4  ;;  %4168 = vrsqrt.f32 %v2712_v2  ;;  %v2733_v3 = vmul.f32 %v4848_v41, %v2721_v25  ;;  %v2734_v10 = vmul.f32 %v4848_v41, %v2722_v18 }
 0x65c   : > { %v2865_v58 = vadd.f32 %v4876_v23, %v2853_v57  ;;  %v2866_v61 = vadd.f32 %v4876_v23, %v2854_v42 }
 0x65d   : > { %v2822_v0 = vadd.f32 %v2821_v56, %v2820_v34  ;;  %v2745_v6 = vadd.f32 %v4864_v51, %v2733_v3  ;;  %v2746_v7 = vadd.f32 %v4864_v51, %v2734_v10 }
 0x65e   : > { %v2874_v62 = vpack.c.bf16 %v2866_v61, %v2865_v58 }
 0x65f   : > { %v2823_v63 = vrot.slane %v2822_v0, 2  ;;  %v2875_v17 = vpack.c.bf16 %v2746_v7, %v2745_v6 }
 0x660   : > { %3052 = vmatprep.mubr.bf16.mxu1 %v2874_v62 }
 0x661   : > { %v2824_v11 = vadd.f32 %v2823_v63, %v2822_v0  ;;  %3053 = vmatmul.mubr.bf16.gmra.mxu1 %v2873_v27 }
 0x663   : > { %v2825_v28 = vrot.slane %v2824_v11, 1 }
 0x665   : > { %v2826_v29 = vadd.f32 %v2825_v28, %v2824_v11 }
 0x667   : > { %v4167_v12 = vpop.eup %4166  ;;  %v2830_v4 = vmul.f32 0.0625, %v2826_v29 }
 0x668   : > { %v2843_v5 = vmul.f32 %v4167_v12, %v4850_v45  ;;  %v2844_v47 = vmul.f32 %v4167_v12, %v4852_v46  ;;  %v4169_v20 = vpop.eup %4168 }
 0x669   : > { %v2834_v49 = vadd.f32 1e-05, %v2830_v4  ;;  %v2723_v45 = vmul.f32 %v4169_v20, %v4828_v1  ;;  %v2724_v46 = vmul.f32 %v4169_v20, %v4831_v9 }
 0x66a   : > { %v2856_v8 = vmul.f32 %v4869_v59, %v2844_v47  ;;  %v2855_v13 = vmul.f32 %v4869_v59, %v2843_v5 }
 0x66b   : > { %4170 = vrsqrt.f32 %v2834_v49  ;;  %v2735_v21 = vmul.f32 %v4848_v41, %v2723_v45  ;;  %v2736_v60 = vmul.f32 %v4848_v41, %v2724_v46 }
 0x66c   : > { %v2867_v14 = vadd.f32 %v4876_v23, %v2855_v13  ;;  %v2868_v15 = vadd.f32 %v4876_v23, %v2856_v8 }
 0x66d   : > { %v2747_v24 = vadd.f32 %v4864_v51, %v2735_v21  ;;  %v2748_v35 = vadd.f32 %v4864_v51, %v2736_v60  ;;  %v3396_v51 = vld [vmem:[%s4992_s6 + $0x7] ss:$0 sm:$0xff] }
 0x66e   : > { %v2876_v19 = vpack.c.bf16 %v2868_v15, %v2867_v14 }
 0x66f   : > { %v2877_v40 = vpack.c.bf16 %v2748_v35, %v2747_v24 }
 0x670   : > { %3060 = vmatprep.mubr.bf16.mxu1 %v2876_v19 }
 0x671   : > { %3061 = vmatmul.mubr.bf16.gmra.mxu1 %v2875_v17 }
 0x678   : > { %v4171_v22 = vpop.eup %4170 }
 0x679   : > { %v2845_v30 = vmul.f32 %v4171_v22, %v2789_v37  ;;  %v2846_v31 = vmul.f32 %v4171_v22, %v2790_v38 }
 0x67b   : > { %v2858_v36 = vmul.f32 %v4869_v59, %v2846_v31  ;;  %v2857_v39 = vmul.f32 %v4869_v59, %v2845_v30 }
 0x67d   : > { %v2869_v1 = vadd.f32 %v4876_v23, %v2857_v39  ;;  %v2870_v9 = vadd.f32 %v4876_v23, %v2858_v36 }
 0x67f   : > { %v2878_v43 = vpack.c.bf16 %v2870_v9, %v2869_v1 }
 0x681   : > { %3068 = vmatprep.mubr.bf16.mxu1 %v2878_v43 }
 0x682   : > { %3069 = vmatmul.mubr.bf16.gmra.mxu1 %v2877_v40 }
 0x711   : > { %v3629_v41 = vpop.f32.mrf.mxu1 }
 0x713   : > { %v3630_v37 = vpop.f32.mrf.mxu1 }
 0x714   : > { %v3631_v38 = vadd.f32 %v3630_v37, %v3629_v41 }
 0x715   : > { %v3632_v44 = vpop.f32.mrf.mxu1 }
 0x716   : > { %v3047_v59 = vadd.f32 %v3631_v38, %v3396_v51 }
 0x717   : > { %v3633_v32 = vpop.f32.mrf.mxu1 }
 0x718   : > { %3077 = vst [vmem:[%s4925_s20] sm:$0xff] %v3047_v59  ;;  %v3634_v23 = vadd.f32 %v3633_v32, %v3632_v44 }
 0x71a   : > { %v3050_v48 = vadd.f32 %v3634_v23, %v3396_v51 }
 0x71c   : > { %3078 = vst [vmem:[%s4925_s20 + $0x8] sm:$0xff] %v3050_v48 }
 0x721   : > { %v3635_v33 = vpop.f32.mrf.mxu1 }
 0x723   : > { %v3636_v50 = vpop.f32.mrf.mxu1 }
 0x724   : > { %v3637_v54 = vadd.f32 %v3636_v50, %v3635_v33 }
 0x725   : > { %v3638_v52 = vpop.f32.mrf.mxu1 }
 0x726   : > { %v3055_v34 = vadd.f32 %v3637_v54, %v3396_v51 }
 0x727   : > { %v3639_v53 = vpop.f32.mrf.mxu1 }
 0x728   : > { %3079 = vst [vmem:[%s4925_s20 + $0x10] sm:$0xff] %v3055_v34  ;;  %v3640_v26 = vadd.f32 %v3639_v53, %v3638_v52 }
 0x72a   : > { %v3058_v42 = vadd.f32 %v3640_v26, %v3396_v51 }
 0x72c   : > { %3080 = vst [vmem:[%s4925_s20 + $0x18] sm:$0xff] %v3058_v42 }
 0x731   : > { %v3641_v57 = vpop.f32.mrf.mxu1 }
 0x733   : > { %v3642_v55 = vpop.f32.mrf.mxu1 }
 0x734   : > { %v3643_v56 = vadd.f32 %v3642_v55, %v3641_v57 }
 0x735   : > { %v3644_v58 = vpop.f32.mrf.mxu1 }
 0x736   : > { %v3063_v61 = vadd.f32 %v3643_v56, %v3396_v51 }
 0x737   : > { %v3645_v0 = vpop.f32.mrf.mxu1 }
 0x738   : > { %3081 = vst [vmem:[%s4925_s20 + $0x20] sm:$0xff] %v3063_v61  ;;  %v3646_v27 = vadd.f32 %v3645_v0, %v3644_v58 }
 0x73a   : > { %v3066_v16 = vadd.f32 %v3646_v27, %v3396_v51 }
 0x73c   : > { %3082 = vst [vmem:[%s4925_s20 + $0x28] sm:$0xff] %v3066_v16 }
 0x742   : > { %v3647_v62 = vpop.f32.mrf.mxu1 }
 0x744   : > { %v3648_v2 = vpop.f32.mrf.mxu1 }
 0x745   : > { %v3649_v63 = vadd.f32 %v3648_v2, %v3647_v62 }
 0x746   : > { %v3650_v11 = vpop.f32.mrf.mxu1 }
 0x747   : > { %v3071_v25 = vadd.f32 %v3649_v63, %v3396_v51 }
 0x748   : > { %v3651_v18 = vpop.f32.mrf.mxu1 }
 0x749   : > { %3083 = vst [vmem:[%s4925_s20 + $0x30] sm:$0xff] %v3071_v25  ;;  %v3652_v28 = vadd.f32 %v3651_v18, %v3650_v11 }
 0x74b   : > { %v3074_v29 = vadd.f32 %v3652_v28, %v3396_v51 }
 0x74d   : > { %3084 = vst [vmem:[%s4925_s20 + $0x38] sm:$0xff] %v3074_v29 }
 0x74e   : > { %4186 = shalt.err (!%p4183_p3)
}
 0x74f   : > { %s4187_s21 = scalar_lea.hbm %s4939_s16, 1024  ;;  %s4191_s8 = scalar_lea.hbm %s4993_s7, 2048 }
 0x750   : > { %p4188_p4 = scmp.ne.s32.totalorder %s4939_s16, %s4187_s21  ;;  %p4192_p9 = scmp.lt.s32.totalorder %s4939_s16, %s4993_s7 }
 0x751   : > { %p4193_p10 = scmp.lt.s32.totalorder %s4191_s8, %s4187_s21 }
 0x752   : > { %p4189_p7 = pnand %p4188_p4, %p4318_p5 }
 0x753   : > { %p4194_p11 = por %p4193_p10, %p4192_p9 }
 0x754   : > { %p4190_p8 = pneg %p4189_p7 }
 0x756   : > { %p4195_p12 = pnand %p4194_p11, %p4190_p8 }
 0x758   : > { %4198 = shalt.err (!%p4195_p12)
}
 0x759   : > { %s4238_s13 = smov 128   ;;  %s4239_s14 = smov 8  }
 0x75a   : > { %4037 = dma.vmem_to_hbm [thread:$0]  (%p4318_p5), %s4941_s15, 1024, %s4939_s16, %s4946_s23, %s4238_s13, %s4238_s13, %s4239_s14  }
 0x75b PF: > { %p4043_p13 = scmp.ge.s32.totalorder %s4233_s27, 2  ;;  %s3115_s28 = sand.u32 1, %s4221_s24  }
 0x75c   : > { %s3116_s17 = scalar_lea.sflag [#allocation3], %s3115_s28 }
 0x75d   : > { %p4040_p0 = pnand %p4043_p13, %p4322_p6 }
 0x75f   : > { %p4041_p1 = pneg %p4040_p0 }
 0x761   : > { %4216 = dma.done.wait (%p4041_p1), %s3116_s17, 1024  }
 0x762   : > { %4218 = vsyncadd (%p4041_p1), %s3116_s17, 4294966272  ;;  %p17_p2 = scmp.ge.s32.totalorder %s4305_s30, 4   ;;  %s4996_s24 = smov %s4225_s25 }
 0x763   : > { %s4997_s25 = smov %s4229_s26  ;;  %s4998_s26 = smov %s4316_s10 }
 0x764   : > { %s4999_s27 = smov %s4305_s30  ;;  %19 = sbr.rel (!%p17_p2) target bundleno = 3 (0x3), region = 100 }
 0x769   :  { %3121 = vsyncpa [#allocation3], 1 }
 0x76a   :  { %3123 = vsyncpa [#allocation3 + $0x1], 1 }

</bundles_post_ra>
